<compile_context>
chip_gen: v5e
topology: v5e:2x2
jax: 0.10.0
libtpu: 0.0.40
codegen_flags: <defaults>
</compile_context>

<pallas_src>
import functools

import jax
import jax.numpy as jnp
from jax import lax
from jax.experimental import pallas as pl
from jax.experimental.pallas import tpu as pltpu


def _round_up(x, m):
    return ((x + m - 1) // m) * m


def _pick_m_tile(m):
    """M tiling: big tiles for big M (few grid steps), a single tile otherwise."""
    if m >= 4096:
        target = 1024
    elif m >= 1024:
        target = 512
    else:
        target = m
    ntiles = -(-m // target)
    tm = _round_up(-(-m // ntiles), 16)
    return tm, ntiles, tm * ntiles


def _row_tile(hw):
    """Largest 'nice' spatial tile (multiple of 16 sublanes) dividing hw, else hw."""
    for ts in (1024, 784, 512, 256):
        if hw > ts and hw % ts == 0:
            return ts
    return hw


# ------------------------------------------------------------------ kernels --
def _matmul_kernel(a_ref, b_ref, s_ref, t_ref, o_ref, *, act):
    """bf16 x bf16 matmul (f32 accumulation) + per-channel scale/shift + activation."""
    acc = jnp.dot(a_ref[...], b_ref[...], preferred_element_type=jnp.float32)
    acc = acc * s_ref[...] + t_ref[...]
    if act == "relu":
        acc = jnp.maximum(acc, 0.0)
    elif act == "relu6":
        acc = jnp.clip(acc, 0.0, 6.0)
    o_ref[...] = acc.astype(o_ref.dtype)


def _se_gate_kernel(x_ref, w1_ref, b1_ref, w2_ref, b2_ref, o_ref, acc_ref, *, inv_hw):
    """Fused SE block: tiled spatial-sum reduction, then FC1->relu->FC2->sigmoid."""
    t = pl.program_id(1)

    @pl.when(t == 0)
    def _():
        acc_ref[...] = jnp.zeros_like(acc_ref)

    acc_ref[...] += jnp.sum(x_ref[0].astype(jnp.float32), axis=0, keepdims=True)

    @pl.when(t == pl.num_programs(1) - 1)
    def _():
        m = acc_ref[...] * inv_hw                                   # (1, C) f32 mean
        m8 = jnp.broadcast_to(m, (8, m.shape[1]))                   # MXU-friendly rows
        h = jnp.maximum(
            jnp.dot(m8, w1_ref[...], preferred_element_type=jnp.float32) + b1_ref[...],
            0.0)
        g = jax.nn.sigmoid(
            jnp.dot(h, w2_ref[...], preferred_element_type=jnp.float32) + b2_ref[...])
        o_ref[0] = g[0:1]


def _se_scale_add_relu_kernel(x_ref, g_ref, r_ref, o_ref):
    """o = relu(x * se_gate + residual); gate broadcast over the spatial axis."""
    v = x_ref[0].astype(jnp.float32) * g_ref[0] + r_ref[0].astype(jnp.float32)
    o_ref[0] = jnp.maximum(v, 0.0).astype(o_ref.dtype)


def _max_relu_kernel(a_ref, b_ref, o_ref):
    o_ref[...] = jnp.maximum(jnp.maximum(a_ref[...], b_ref[...]), 0.0).astype(o_ref.dtype)


def _tail_kernel(x_ref, w_ref, b_ref, logit_ref, prob_ref, *, inv_hw, n_rows):
    """Fused tail: global avg-pool -> Linear -> ReLU6 -> softmax (logits + probs)."""
    feat = jnp.sum(x_ref[...].astype(jnp.float32), axis=1) * inv_hw      # (N, C)
    pad = jnp.zeros((8 - n_rows, feat.shape[1]), jnp.float32)            # MXU-friendly rows
    feat8 = jnp.concatenate([feat, pad], axis=0)
    logits8 = jnp.dot(feat8.astype(jnp.bfloat16), w_ref[...],
                      preferred_element_type=jnp.float32) + b_ref[...]
    logits = jnp.clip(logits8[:n_rows], 0.0, 6.0)                        # ReLU6
    z = logits - jnp.max(logits, axis=-1, keepdims=True)
    e = jnp.exp(z)
    logit_ref[...] = logits
    prob_ref[...] = e / jnp.sum(e, axis=-1, keepdims=True)


# ----------------------------------------------------------------- wrappers --
def fused_matmul(a, b, scale, shift, act="none", out_dtype=jnp.bfloat16):
    """a: (M, K) bf16, b: (K, Nc) bf16, scale/shift: (Nc,) f32 -> act(a@b*scale+shift).

    Grid = (M tiles, Nc tiles); Nc tiled at 256 so large weights pipeline their DMA
    and both v7x TensorCores get work; small weights stay single-tile/resident."""
    M, K = a.shape
    Nc = b.shape[1]
    tm, ntm, Mp = _pick_m_tile(M)
    tn = Nc if Nc <= 256 else 256
    ntn = Nc // tn
    if Mp != M:
        a = jnp.pad(a, ((0, Mp - M), (0, 0)))
    out = pl.pallas_call(
        functools.partial(_matmul_kernel, act=act),
        out_shape=jax.ShapeDtypeStruct((Mp, Nc), out_dtype),
        grid=(ntm, ntn),
        in_specs=[
            pl.BlockSpec((tm, K), lambda m, n: (m, 0)),
            pl.BlockSpec((K, tn), lambda m, n: (0, n)),
            pl.BlockSpec((1, tn), lambda m, n: (0, n)),
            pl.BlockSpec((1, tn), lambda m, n: (0, n)),
        ],
        out_specs=pl.BlockSpec((tm, tn), lambda m, n: (m, n)),
        compiler_params=pltpu.CompilerParams(
            dimension_semantics=("parallel", "parallel")),
    )(a, b, scale.reshape(1, Nc), shift.reshape(1, Nc))
    return out[:M] if Mp != M else out


def grouped_fused_matmul(a, b, scale, shift, *, sg, act, out_dtype=jnp.bfloat16):
    """Grouped (super-group block-diagonal) matmul.

    a: (M, n_sg*9*sg) channel-major im2col patches, b: (n_sg*9*sg, sg) stacked
    per-super-group weight blocks.  Grid = (M tiles, super-group); each step is a
    dense (tm, 9*sg) x (9*sg, sg) MXU matmul -> no lane-starved per-group work."""
    M, ktot = a.shape
    kg = 9 * sg
    n_sg = ktot // kg
    Nc = n_sg * sg
    tm, ntm, Mp = _pick_m_tile(M)
    if Mp != M:
        a = jnp.pad(a, ((0, Mp - M), (0, 0)))
    out = pl.pallas_call(
        functools.partial(_matmul_kernel, act=act),
        out_shape=jax.ShapeDtypeStruct((Mp, Nc), out_dtype),
        grid=(ntm, n_sg),
        in_specs=[
            pl.BlockSpec((tm, kg), lambda m, g: (m, g)),
            pl.BlockSpec((kg, sg), lambda m, g: (g, 0)),
            pl.BlockSpec((1, sg), lambda m, g: (0, g)),
            pl.BlockSpec((1, sg), lambda m, g: (0, g)),
        ],
        out_specs=pl.BlockSpec((tm, sg), lambda m, g: (m, g)),
        compiler_params=pltpu.CompilerParams(
            dimension_semantics=("parallel", "parallel")),
    )(a, b, scale.reshape(1, Nc), shift.reshape(1, Nc))
    return out[:M] if Mp != M else out


def conv_bn_act(x, w, scale, shift, *, ksize, stride, pad, act="none"):
    """x: (N,H,W,C) bf16; w: (k*k*C, Cout) bf16 (tap-major rows); scale/shift: (Cout,) f32.
    Returns (N, OH, OW, Cout) bf16."""
    # TODO(synk): fuse im2col into the matmul kernel (halo-read input tiles) to avoid
    # the k^2-sized XLA patches round-trip through HBM.
    N, H, W, C = x.shape
    k = ksize
    Cout = w.shape[1]
    OH = (H + 2 * pad - k) // stride + 1
    OW = (W + 2 * pad - k) // stride + 1
    if k == 1 and stride == 1:
        patches = x.reshape(N * H * W, C)
    else:
        xp = jnp.pad(x, ((0, 0), (pad, pad), (pad, pad), (0, 0))) if pad > 0 else x
        taps = []
        for i in range(k):
            for j in range(k):
                taps.append(lax.slice(
                    xp, (0, i, j, 0),
                    (N, i + stride * (OH - 1) + 1, j + stride * (OW - 1) + 1, C),
                    (1, stride, stride, 1)))
        patches = jnp.stack(taps, axis=3).reshape(N * OH * OW, k * k * C)
    out = fused_matmul(patches, w, scale, shift, act=act)      # (M, Cout) bf16
    return out.reshape(N, OH, OW, Cout)


def grouped_conv3x3_bn_relu(x, w, scale, shift, *, stride, sg):
    """Grouped 3x3 conv (cardinality 32, packed into 128-wide super-groups) + BN + relu.
    x: (N,H,W,C) bf16; w: (n_sg*9*sg, sg) bf16; scale/shift: (C,) f32."""
    N, H, W, C = x.shape
    OH = (H + 2 - 3) // stride + 1
    OW = (W + 2 - 3) // stride + 1
    xp = jnp.pad(x, ((0, 0), (1, 1), (1, 1), (0, 0)))
    taps = []
    for i in range(3):
        for j in range(3):
            taps.append(lax.slice(
                xp, (0, i, j, 0),
                (N, i + stride * (OH - 1) + 1, j + stride * (OW - 1) + 1, C),
                (1, stride, stride, 1)))
    # Channel-major layout (col = c*9 + tap) so each super-group is a contiguous K block.
    patches = jnp.stack(taps, axis=-1).reshape(N * OH * OW, C * 9)
    out = grouped_fused_matmul(patches, w, scale, shift, sg=sg, act="relu")
    return out.reshape(N, OH, OW, C)


def se_gate(x, w1, b1, w2, b2):
    """Fused SE squeeze + excitation: sigmoid(relu(mean_hw(x) @ w1 + b1) @ w2 + b2).
    x: (N,H,W,C) bf16; SE MLP weights kept f32. Returns (N, 1, C) f32 gate."""
    # TODO(synk): fuse the squeeze (spatial sum) into the expand-conv epilogue to
    # avoid re-reading the freshly written feature map.
    N, H, W, C = x.shape
    HW = H * W
    TS = _row_tile(HW)
    cr = w1.shape[1]
    return pl.pallas_call(
        functools.partial(_se_gate_kernel, inv_hw=1.0 / HW),
        out_shape=jax.ShapeDtypeStruct((N, 1, C), jnp.float32),
        grid=(N, HW // TS),
        in_specs=[
            pl.BlockSpec((1, TS, C), lambda n, t: (n, t, 0)),
            pl.BlockSpec((C, cr), lambda n, t: (0, 0)),
            pl.BlockSpec((1, cr), lambda n, t: (0, 0)),
            pl.BlockSpec((cr, C), lambda n, t: (0, 0)),
            pl.BlockSpec((1, C), lambda n, t: (0, 0)),
        ],
        out_specs=pl.BlockSpec((1, 1, C), lambda n, t: (n, 0, 0)),
        scratch_shapes=[pltpu.VMEM((1, C), jnp.float32)],
        compiler_params=pltpu.CompilerParams(
            dimension_semantics=("parallel", "arbitrary")),
    )(x.reshape(N, HW, C), w1, b1.reshape(1, cr), w2, b2.reshape(1, C))


def se_scale_add_relu(x, gate, residual):
    """relu(x * gate + residual); x, residual: (N,H,W,C) bf16, gate: (N,1,C) f32."""
    N, H, W, C = x.shape
    HW = H * W
    TS = _row_tile(HW)
    out = pl.pallas_call(
        _se_scale_add_relu_kernel,
        out_shape=jax.ShapeDtypeStruct((N, HW, C), x.dtype),
        grid=(N, HW // TS),
        in_specs=[
            pl.BlockSpec((1, TS, C), lambda n, t: (n, t, 0)),
            pl.BlockSpec((1, 1, C), lambda n, t: (n, 0, 0)),
            pl.BlockSpec((1, TS, C), lambda n, t: (n, t, 0)),
        ],
        out_specs=pl.BlockSpec((1, TS, C), lambda n, t: (n, t, 0)),
        compiler_params=pltpu.CompilerParams(
            dimension_semantics=("parallel", "parallel")),
    )(x.reshape(N, HW, C), gate, residual.reshape(N, HW, C))
    return out.reshape(N, H, W, C)


def _elementwise_max_relu(a, b):
    """relu(max(a, b)) elementwise over (N, HW, C), tiled over HW."""
    N, HW, C = a.shape
    TS = _row_tile(HW)
    return pl.pallas_call(
        _max_relu_kernel,
        out_shape=jax.ShapeDtypeStruct((N, HW, C), a.dtype),
        grid=(N, HW // TS),
        in_specs=[pl.BlockSpec((1, TS, C), lambda n, t: (n, t, 0)),
                  pl.BlockSpec((1, TS, C), lambda n, t: (n, t, 0))],
        out_specs=pl.BlockSpec((1, TS, C), lambda n, t: (n, t, 0)),
        compiler_params=pltpu.CompilerParams(
            dimension_semantics=("parallel", "parallel")),
    )(a, b)


def maxpool_relu(x):
    """relu(MaxPool2d(kernel_size=3, stride=2, padding=1)(x)), x: (N,H,W,C), H,W even."""
    # TODO(synk): single halo-read Pallas kernel would remove the XLA intermediates.
    N, H, W, C = x.shape
    OH, OW = H // 2, W // 2
    xp = jnp.pad(x, ((0, 0), (1, 1), (1, 1), (0, 0)), constant_values=-jnp.inf)
    # rows: max(xp[2oh], xp[2oh+1], xp[2oh+2])
    a = xp[:, :2 * OH].reshape(N, OH, 2, W + 2, C)
    rm = jnp.maximum(jnp.maximum(a[:, :, 0], a[:, :, 1]),
                     xp[:, 2:2 * OH + 2].reshape(N, OH, 2, W + 2, C)[:, :, 0])
    # cols: pair-max(cols 2ow, 2ow+1) and the +2 tap; final combine + relu in Pallas.
    b = rm[:, :, :2 * OW].reshape(N, OH, OW, 2, C)
    pm = jnp.maximum(b[:, :, :, 0], b[:, :, :, 1])
    t2 = rm[:, :, 2:2 * OW + 2].reshape(N, OH, OW, 2, C)[:, :, :, 0]
    out = _elementwise_max_relu(pm.reshape(N, OH * OW, C), t2.reshape(N, OH * OW, C))
    return out.reshape(N, OH, OW, C)


def classifier_tail(x, w, b):
    """Fused AvgPool2d(7) -> Linear(2048, n_classes) -> ReLU6 -> softmax.
    x: (N,7,7,C) bf16; w: (C, nc) bf16; b: (nc,) f32. Returns (logits, probs) f32."""
    N, H, W, C = x.shape
    HW = H * W
    nc = w.shape[1]
    return pl.pallas_call(
        functools.partial(_tail_kernel, inv_hw=1.0 / HW, n_rows=N),
        out_shape=(jax.ShapeDtypeStruct((N, nc), jnp.float32),
                   jax.ShapeDtypeStruct((N, nc), jnp.float32)),
        grid=(1,),
        in_specs=[
            pl.BlockSpec((N, HW, C), lambda i: (0, 0, 0)),
            pl.BlockSpec((C, nc), lambda i: (0, 0)),
            pl.BlockSpec((1, nc), lambda i: (0, 0)),
        ],
        out_specs=(pl.BlockSpec((N, nc), lambda i: (0, 0)),
                   pl.BlockSpec((N, nc), lambda i: (0, 0))),
    )(x.reshape(N, HW, C), w, b.reshape(1, nc))


# --------------------------------------------------------------- parameters --
def _w(key, shape, fan_in):
    return ((2.0 / fan_in) ** 0.5) * jax.random.normal(key, shape, dtype=jnp.float32)


def _make_bn(key, c):
    k1, k2 = jax.random.split(key)
    gamma = 1.0 + 0.1 * jax.random.normal(k1, (c,), jnp.float32)
    beta = 0.1 * jax.random.normal(k2, (c,), jnp.float32)
    mean = jnp.zeros((c,), jnp.float32)
    var = jnp.ones((c,), jnp.float32)
    return gamma, beta, mean, var


def _fold_bn(gamma, beta, mean, var, bias=None, eps=1e-5):
    s = gamma / jnp.sqrt(var + eps)
    b = bias if bias is not None else 0.0
    return s, (b - mean) * s + beta


def make_block_params(key, cin, planes, stride, cardinality=32, r=16, mul=4):
    cout = planes * mul
    keys = jax.random.split(key, 12)
    p = {"stride": stride}
    # 1x1 reduce
    b1 = 0.01 * jax.random.normal(keys[1], (planes,), jnp.float32)
    p["w1"] = _w(keys[0], (cin, planes), cin).astype(jnp.bfloat16)
    p["s1"], p["t1"] = _fold_bn(*_make_bn(keys[2], planes), bias=b1)
    # grouped 3x3 (cardinality groups) packed into 128-wide MXU "super-groups":
    # weight (n_sg, 9*sg, sg) block-diagonal inside each super-group, rows = ci_local*9+tap.
    cg = planes // cardinality
    sg = min(planes, 128)
    n_sg = planes // sg
    wg = _w(keys[3], (cardinality, 9, cg, cg), 9 * cg)
    w2 = jnp.zeros((n_sg, 9 * sg, sg), jnp.float32)
    for g in range(cardinality):
        s = (g * cg) // sg
        base = g * cg - s * sg
        blk = jnp.transpose(wg[g], (1, 0, 2)).reshape(9 * cg, cg)   # rows = ci*9 + tap
        w2 = w2.at[s, base * 9:(base + cg) * 9, base:base + cg].set(blk)
    p["w2"] = w2.reshape(n_sg * 9 * sg, sg).astype(jnp.bfloat16)
    p["sg"] = sg
    b2 = 0.01 * jax.random.normal(keys[4], (planes,), jnp.float32)
    p["s2"], p["t2"] = _fold_bn(*_make_bn(keys[5], planes), bias=b2)
    # 1x1 expand
    b3 = 0.01 * jax.random.normal(keys[7], (cout,), jnp.float32)
    p["w3"] = _w(keys[6], (planes, cout), planes).astype(jnp.bfloat16)
    p["s3"], p["t3"] = _fold_bn(*_make_bn(keys[8], cout), bias=b3)
    # SE MLP (kept in f32; tiny weights, gate math stays f32)
    cr = cout // r
    p["fc1w"] = _w(keys[9], (cout, cr), cout)
    p["fc1b"] = jnp.zeros((cr,), jnp.float32)
    p["fc2w"] = _w(keys[10], (cr, cout), cr)
    p["fc2b"] = jnp.zeros((cout,), jnp.float32)
    # projection shortcut (1x1 conv, bias=False, + BN)
    if stride != 1 or cin != cout:
        kd = jax.random.split(keys[11], 2)
        p["wd"] = _w(kd[0], (cin, cout), cin).astype(jnp.bfloat16)
        p["sd"], p["td"] = _fold_bn(*_make_bn(kd[1], cout), bias=None)
    return p


def make_params(key, n_classes=10, num_blocks=(1, 1, 1, 1)):
    keys = jax.random.split(key, 5)
    params = {}
    params["conv1_w"] = _w(keys[0], (7 * 7 * 3, 64), 7 * 7 * 3).astype(jnp.bfloat16)
    params["conv1_b"] = 0.01 * jax.random.normal(keys[1], (64,), jnp.float32)
    in_planes = 64
    layers = []
    layer_keys = jax.random.split(keys[2], 4)
    plan = [(64, 1, num_blocks[0]), (128, 2, num_blocks[1]),
            (256, 2, num_blocks[2]), (512, 2, num_blocks[3])]
    for (planes, stride, nb), lk in zip(plan, layer_keys):
        bks = jax.random.split(lk, nb)
        blocks = []
        for bi in range(nb):
            s = stride if bi == 0 else 1
            blocks.append(make_block_params(bks[bi], in_planes, planes, s))
            in_planes = planes * 4
        layers.append(blocks)
    params["layers"] = layers
    params["cls_w"] = _w(keys[3], (512 * 4, n_classes), 512 * 4).astype(jnp.bfloat16)
    params["cls_b"] = 0.01 * jax.random.normal(keys[4], (n_classes,), jnp.float32)
    return params


# ----------------------------------------------------------------- forward ---
def block_forward(p, x):
    identity = x
    out = conv_bn_act(x, p["w1"], p["s1"], p["t1"],
                      ksize=1, stride=1, pad=0, act="relu")
    out = grouped_conv3x3_bn_relu(out, p["w2"], p["s2"], p["t2"],
                                  stride=p["stride"], sg=p["sg"])
    out = conv_bn_act(out, p["w3"], p["s3"], p["t3"],
                      ksize=1, stride=1, pad=0, act="none")
    gate = se_gate(out, p["fc1w"], p["fc1b"], p["fc2w"], p["fc2b"])   # (N, 1, C) f32
    if "wd" in p:
        identity = conv_bn_act(x, p["wd"], p["sd"], p["td"],
                               ksize=1, stride=p["stride"], pad=0, act="none")
    return se_scale_add_relu(out, gate, identity)


def se_resnext_forward(params, x_nchw):
    x = jnp.transpose(x_nchw, (0, 2, 3, 1)).astype(jnp.bfloat16)      # NCHW -> NHWC, bf16
    # conv1 (7x7 /2) + relu  (no BN on conv1 in the reference module)
    x = conv_bn_act(x, params["conv1_w"],
                    jnp.ones((64,), jnp.float32), params["conv1_b"],
                    ksize=7, stride=2, pad=3, act="relu")
    # maxpool(3, /2, pad 1) + relu
    x = maxpool_relu(x)
    # layer1..4
    for blocks in params["layers"]:
        for bp in blocks:
            x = block_forward(bp, x)
    # AvgPool2d(7) -> flatten -> Linear -> ReLU6 -> softmax, all in one fused kernel
    logits, probs = classifier_tail(x, params["cls_w"], params["cls_b"])
    return logits, probs


# -------------------------------------------------------------------- main ---
if __name__ == "__main__":
    key = jax.random.PRNGKey(0)
    pkey, xkey = jax.random.split(key)
    # The architecture (AvgPool2d(7) feeding Linear(2048, n_classes)) requires the
    # canonical 224x224 input; batch kept small (2), num_blocks = [1, 1, 1, 1].
    params = make_params(pkey, n_classes=10, num_blocks=(1, 1, 1, 1))
    x = jax.random.normal(xkey, (2, 3, 224, 224), dtype=jnp.float32)

    logits, probs = se_resnext_forward(params, x)
    jax.block_until_ready((logits, probs))

    assert logits.shape == (2, 10) and probs.shape == (2, 10)
    assert bool(jnp.all(jnp.isfinite(logits)))
    assert bool(jnp.all(jnp.isfinite(probs)))
    assert bool(jnp.allclose(jnp.sum(probs, axis=-1), 1.0, atol=1e-4))
    print("KERNEL_OK")
</pallas_src>

<mosaic_0001>
module attributes {stable_mosaic.version = 11 : i64} {
  func.func @_matmul_kernel(%arg0: i32, %arg1: i32, %arg2: memref<1008x147xbf16, #tpu.memory_space<vmem>>, %arg3: memref<147x64xbf16, #tpu.memory_space<vmem>>, %arg4: memref<1x64xf32, #tpu.memory_space<vmem>>, %arg5: memref<1x64xf32, #tpu.memory_space<vmem>>, %arg6: memref<1008x64xbf16, #tpu.memory_space<vmem>>) attributes {dimension_semantics = [#tpu.dimension_semantics<parallel>, #tpu.dimension_semantics<parallel>], iteration_bounds = array<i64: 25, 1>, scalar_prefetch = 0 : i64, scratch_operands = 0 : i64, tpu.core_type = #tpu.core_type<tc>, window_params = [{transform_indices = @transform_0, window_bounds = array<i64: 1008, 147>}, {transform_indices = @transform_1, window_bounds = array<i64: 147, 64>}, {transform_indices = @transform_2, window_bounds = array<i64: 1, 64>}, {transform_indices = @transform_3, window_bounds = array<i64: 1, 64>}, {transform_indices = @transform_4, window_bounds = array<i64: 1008, 64>}]} {
    %c0 = arith.constant 0 : index
    %c0_0 = arith.constant 0 : index
    %0 = vector.load %arg2[%c0, %c0_0] : memref<1008x147xbf16, #tpu.memory_space<vmem>>, vector<1008x147xbf16>
    %c0_1 = arith.constant 0 : index
    %c0_2 = arith.constant 0 : index
    %1 = vector.load %arg3[%c0_1, %c0_2] : memref<147x64xbf16, #tpu.memory_space<vmem>>, vector<147x64xbf16>
    %cst = arith.constant dense<0.000000e+00> : vector<1008x64xf32>
    %2 = tpu.matmul %0, %1, %cst {dimension_numbers = #tpu.dot_dimension_numbers<[1], [0], [0], [1], [0, 0, 1, 1], [], []>} : vector<1008x147xbf16>, vector<147x64xbf16>, vector<1008x64xf32> -> vector<1008x64xf32>
    %c0_3 = arith.constant 0 : index
    %c0_4 = arith.constant 0 : index
    %3 = vector.load %arg4[%c0_3, %c0_4] : memref<1x64xf32, #tpu.memory_space<vmem>>, vector<1x64xf32>
    %4 = vector.broadcast %3 : vector<1x64xf32> to vector<1008x64xf32>
    %5 = arith.mulf %2, %4 : vector<1008x64xf32>
    %c0_5 = arith.constant 0 : index
    %c0_6 = arith.constant 0 : index
    %6 = vector.load %arg5[%c0_5, %c0_6] : memref<1x64xf32, #tpu.memory_space<vmem>>, vector<1x64xf32>
    %7 = vector.broadcast %6 : vector<1x64xf32> to vector<1008x64xf32>
    %8 = arith.addf %5, %7 : vector<1008x64xf32>
    %cst_7 = arith.constant 0.000000e+00 : f32
    %9 = vector.broadcast %cst_7 : f32 to vector<1008x64xf32>
    %10 = arith.maximumf %8, %9 : vector<1008x64xf32>
    %11 = arith.truncf %10 : vector<1008x64xf32> to vector<1008x64xbf16>
    %c0_8 = arith.constant 0 : index
    %c0_9 = arith.constant 0 : index
    %12 = vector.load %arg6[%c0_8, %c0_9] : memref<1008x64xbf16, #tpu.memory_space<vmem>>, vector<1008x64xbf16>
    tpu.vector_store %arg6[%c0_8, %c0_9], %11 {strides = array<i32>} : memref<1008x64xbf16, #tpu.memory_space<vmem>>, vector<1008x64xbf16>,
    return
  }
  func.func @transform_0(%arg0: i32, %arg1: i32) -> (i32, i32) {
    %c0_i32 = arith.constant 0 : i32
    %c0_i32_0 = arith.constant 0 : i32
    return %arg0, %c0_i32 : i32, i32
  }
  func.func @transform_1(%arg0: i32, %arg1: i32) -> (i32, i32) {
    %c0_i32 = arith.constant 0 : i32
    %c0_i32_0 = arith.constant 0 : i32
    return %c0_i32, %arg1 : i32, i32
  }
  func.func @transform_2(%arg0: i32, %arg1: i32) -> (i32, i32) {
    %c0_i32 = arith.constant 0 : i32
    %c0_i32_0 = arith.constant 0 : i32
    return %c0_i32, %arg1 : i32, i32
  }
  func.func @transform_3(%arg0: i32, %arg1: i32) -> (i32, i32) {
    %c0_i32 = arith.constant 0 : i32
    %c0_i32_0 = arith.constant 0 : i32
    return %c0_i32, %arg1 : i32, i32
  }
  func.func @transform_4(%arg0: i32, %arg1: i32) -> (i32, i32) {
    %c0_i32 = arith.constant 0 : i32
    return %arg0, %arg1 : i32, i32
  }
}

</mosaic_0001>

<bundles_post_ra>
// kernel: tpu_custom_call.1
= control target key start
LH: loop header
LB: loop body
LE: loop exit
PB: predicated region body
PF: predicated region fallthrough
CT: control target
= control target key end

     0   :  { %s3480_s15 = smov 0   ;;  %s3482_s16 = smov 0   ;;  %s4550_s0 = inlined_call_operand.vmem [shape: bf16[25200,147], index: 0, kind: input, shape index: {}]   ;;  %s4551_s1 = inlined_call_operand.vmem [shape: bf16[147,64], index: 1, kind: input, shape index: {}]   ;;  %s4552_s2 = inlined_call_operand.vmem [shape: f32[1,64], index: 2, kind: input, shape index: {}]   ;;  %s4553_s3 = inlined_call_operand.vmem [shape: f32[1,64], index: 3, kind: input, shape index: {}]   ;;  %s4554_s4 = inlined_call_operand.vmem [shape: bf16[25200,64], index: 4, kind: output, shape index: {}]  }
   0x1   :  { %s3484_s17 = smov 0  }
   0x2 LB: > { %s26_s18 = sadd.s32 1, %s3448_s16  ;;  %p2644_p0 = scmp.ge.s32.totalorder %s3452_s17, 1  ;;  %s3452_s17 = sphi %s3484_s17, %s14_s17   ;;  %s3448_s16 = sphi %s3482_s16, %s4556_s16   ;;  %s3444_s15 = sphi %s3480_s15, %s4555_s15  }
   0x3   : > { %p28_p1 = scmp.ge.s32.totalorder %s26_s18, 25  ;;  %p203_p2 = scmp.lt.s32.totalorder %s3452_s17, 26 }
   0x5   : > { %s4558_s18 = smov (%p28_p1, %s26_s18), 0  ;;  %p204_p3 = pnand %p2644_p0, %p203_p2 }
   0x6   : > { %s243_s23 = smul.u32 (!%p204_p3), 126, %s3444_s15 }
   0x7   : > { %207 = sbr.rel (%p204_p3) target bundleno = 691 (0x2b3), region = 36 }
   0x8   : > { %p244_p4 = scmp.lt.s32.totalorder (!%p204_p3), %s243_s23, 3149 }
   0xc   : > { %v3387_v0 = vld [vmem:[%s4551_s1 + $0x38] sm:$0xff]  ;;  %v414_v1 = vld [vmem:[%s4551_s1 + $0x48] sm:$0x3]  ;;  %vm1229_vm0 = vcmask 1040384   ;;  %vm1230_vm1 = vcmask 1041408   ;;  %v3386_v3 = vld [vmem:[%s4551_s1 + $0x30] sm:$0xff] }
   0xd   : > { %v1019_v2 = vunpack.c.l.b16 %v414_v1  ;;  %1236 = vmatpush.bf16.msra.mxu0 %v3387_v0  ;;  %3389 = vmatpush.bf16.msra.mxu2 %v3387_v0  ;;  %v3454_v4 = vmov 65535   ;;  %s4560_s23 = smov (!%p244_p4, %s243_s23), 3149  ;;  %v3385_v9 = vld [vmem:[%s4551_s1 + $0x28] sm:$0xff]  ;;  %v3388_v10 = vld [vmem:[%s4551_s1 + $0x40] sm:$0xff]  ;;  %vm1039_vm2 = vcmask 154624   ;;  %v3383_v15 = vld [vmem:[%s4551_s1 + $0x18] sm:$0xff] }
   0xe   : > { %v1231_v5 = vsel %vm1229_vm0, 4294967295, %v3454_v4  ;;  %s3253_s30 = sshll.u32 %s4560_s23, 3  ;;  %v3384_v14 = vld [vmem:[%s4551_s1 + $0x20] sm:$0xff]  ;;  %v3382_v16 = vld [vmem:[%s4551_s1 + $0x10] sm:$0xff]  ;;  %v3381_v20 = vld [vmem:[%s4551_s1 + $0x8] sm:$0xff]  ;;  %s2647_s26 = sshll.u32 %s4560_s23, 2 }
   0xf   : > { %v1029_v6 = vpack.c.b16 %v1019_v2, %v1019_v2  ;;  %v1232_v7 = vsel %vm1230_vm1, %v1231_v5, 0  ;;  %s3519_s7 = scalar_lea.vmem %s4550_s0, %s3253_s30  ;;  %v3380_v24 = vld [vmem:[%s4551_s1] sm:$0xff]  ;;  %s3651_s29 = scalar_lea.vmem %s4554_s4, %s2647_s26  ;;  %vm2396_vm3 = vcmask 519168  }
  0x10   : > { %v3254_v11 = vld [vmem:[%s3519_s7 + $0x4] sm:$0xf]  ;;  %v2652_v12 = vld [vmem:[%s3519_s7 + $0x8] sm:$0xf0]  ;;  %v3320_v17 = vld [vmem:[%s3519_s7 + $0x214] sm:$0xf] }
  0x11   : > { %v1234_v8 = vand.u32 %v1232_v7, %v1029_v6  ;;  %1237 = vmatpush.bf16.msra.mxu0 %v3386_v3  ;;  %3390 = vmatpush.bf16.msra.mxu2 %v3386_v3  ;;  %v2655_v13 = vor.u32 %v3254_v11, %v2652_v12  ;;  %v2916_v18 = vld [vmem:[%s3519_s7 + $0x218] sm:$0xf0]  ;;  %v3256_v21 = vld [vmem:[%s3519_s7 + $0x14] sm:$0xf]  ;;  %v2650_v25 = vld [vmem:[%s3519_s7] sm:$0xf] }
  0x12   : > { %v2919_v19 = vor.u32 %v3320_v17, %v2916_v18  ;;  %v2660_v22 = vld [vmem:[%s3519_s7 + $0x18] sm:$0xf0]  ;;  %v3255_v26 = vld [vmem:[%s3519_s7 + $0x4] sm:$0xf0]  ;;  %v2898_v27 = vld [vmem:[%s3519_s7 + $0x1f0] sm:$0xf] }
  0x13   : > { %1566 = vmatpush.bf16.msra.mxu1 %v1234_v8  ;;  %3397 = vmatpush.bf16.msra.mxu3 %v1234_v8  ;;  %v2663_v23 = vor.u32 %v3256_v21, %v2660_v22  ;;  %v3317_v28 = vld [vmem:[%s3519_s7 + $0x1f4] sm:$0xf0]  ;;  %v2651_v29 = vor.u32 %v3255_v26, %v2650_v25  ;;  %v3322_v31 = vld [vmem:[%s3519_s7 + $0x224] sm:$0xf]  ;;  %v2924_v32 = vld [vmem:[%s3519_s7 + $0x228] sm:$0xf0] }
  0x14   : > { %v2899_v30 = vor.u32 %v3317_v28, %v2898_v27  ;;  %v2927_v33 = vor.u32 %v3322_v31, %v2924_v32  ;;  %v3258_v34 = vld [vmem:[%s3519_s7 + $0x24] sm:$0xf]  ;;  %v2668_v35 = vld [vmem:[%s3519_s7 + $0x28] sm:$0xf0]  ;;  %v2658_v37 = vld [vmem:[%s3519_s7 + $0x10] sm:$0xf] }
  0x15   : > { %1238 = vmatpush.bf16.msra.mxu0 %v3385_v9  ;;  %3391 = vmatpush.bf16.msra.mxu2 %v3385_v9  ;;  %v2671_v36 = vor.u32 %v3258_v34, %v2668_v35  ;;  %v3257_v38 = vld [vmem:[%s3519_s7 + $0x14] sm:$0xf0]  ;;  %v2906_v39 = vld [vmem:[%s3519_s7 + $0x200] sm:$0xf]  ;;  %v3319_v40 = vld [vmem:[%s3519_s7 + $0x204] sm:$0xf0] }
  0x16   : > { %v2659_v41 = vor.u32 %v3257_v38, %v2658_v37  ;;  %v2907_v42 = vor.u32 %v3319_v40, %v2906_v39  ;;  %v3324_v43 = vld [vmem:[%s3519_s7 + $0x234] sm:$0xf]  ;;  %v2932_v44 = vld [vmem:[%s3519_s7 + $0x238] sm:$0xf0]  ;;  %v2666_v49 = vld [vmem:[%s3519_s7 + $0x20] sm:$0xf] }
  0x17   : > { %1567 = vmatpush.bf16.msra.mxu1 %v3388_v10  ;;  %3398 = vmatpush.bf16.msra.mxu3 %v3388_v10  ;;  %v2935_v45 = vor.u32 %v3324_v43, %v2932_v44  ;;  %v3260_v46 = vld [vmem:[%s3519_s7 + $0x34] sm:$0xf]  ;;  %v2676_v47 = vld [vmem:[%s3519_s7 + $0x38] sm:$0xf0]  ;;  %v3259_v50 = vld [vmem:[%s3519_s7 + $0x24] sm:$0xf0] }
  0x18   : > { %v2679_v48 = vor.u32 %v3260_v46, %v2676_v47  ;;  %v2914_v51 = vld [vmem:[%s3519_s7 + $0x210] sm:$0xf]  ;;  %v3321_v52 = vld [vmem:[%s3519_s7 + $0x214] sm:$0xf0]  ;;  %v2667_v53 = vor.u32 %v3259_v50, %v2666_v49  ;;  %v3326_v55 = vld [vmem:[%s3519_s7 + $0x244] sm:$0xf] }
  0x19   : > { %1239 = vmatpush.bf16.msra.mxu0 %v3384_v14  ;;  %3392 = vmatpush.bf16.msra.mxu2 %v3384_v14  ;;  %v2915_v54 = vor.u32 %v3321_v52, %v2914_v51  ;;  %v2940_v56 = vld [vmem:[%s3519_s7 + $0x248] sm:$0xf0]  ;;  %v3262_v58 = vld [vmem:[%s3519_s7 + $0x44] sm:$0xf]  ;;  %v2674_v61 = vld [vmem:[%s3519_s7 + $0x30] sm:$0xf] }
  0x1a   : > { %3188 = vmatmul.msk.bf16.vlgmr.msra.gmra.mxu1 %vm1039_vm2, %v2655_v13  ;;  %3221 = vmatmul.msk.bf16.vlgmr.msra.gmra.mxu3 %vm1039_vm2, %v2919_v19  ;;  %v2943_v57 = vor.u32 %v3326_v55, %v2940_v56  ;;  %v2684_v59 = vld [vmem:[%s3519_s7 + $0x48] sm:$0xf0]  ;;  %v3261_v62 = vld [vmem:[%s3519_s7 + $0x34] sm:$0xf0]  ;;  %v2922_v63 = vld [vmem:[%s3519_s7 + $0x220] sm:$0xf] }
  0x1b   : > { %v2687_v60 = vor.u32 %v3262_v58, %v2684_v59  ;;  %v3323_v0 = vld [vmem:[%s3519_s7 + $0x224] sm:$0xf0]  ;;  %v2675_v1 = vor.u32 %v3261_v62, %v2674_v61  ;;  %v3328_v3 = vld [vmem:[%s3519_s7 + $0x254] sm:$0xf]  ;;  %v2948_v4 = vld [vmem:[%s3519_s7 + $0x258] sm:$0xf0] }
  0x1c   : > { %v2923_v2 = vor.u32 %v3323_v0, %v2922_v63  ;;  %v2951_v5 = vor.u32 %v3328_v3, %v2948_v4  ;;  %v3264_v6 = vld [vmem:[%s3519_s7 + $0x54] sm:$0xf]  ;;  %v2692_v7 = vld [vmem:[%s3519_s7 + $0x58] sm:$0xf0]  ;;  %v2682_v9 = vld [vmem:[%s3519_s7 + $0x40] sm:$0xf] }
  0x1d   : > { %1240 = vmatpush.bf16.msra.mxu0 %v3383_v15  ;;  %3393 = vmatpush.bf16.msra.mxu2 %v3383_v15  ;;  %v2695_v8 = vor.u32 %v3264_v6, %v2692_v7  ;;  %v3263_v10 = vld [vmem:[%s3519_s7 + $0x44] sm:$0xf0]  ;;  %v2930_v11 = vld [vmem:[%s3519_s7 + $0x230] sm:$0xf]  ;;  %v3325_v12 = vld [vmem:[%s3519_s7 + $0x234] sm:$0xf0] }
  0x1e   : > { %v2683_v13 = vor.u32 %v3263_v10, %v2682_v9  ;;  %v2931_v14 = vor.u32 %v3325_v12, %v2930_v11  ;;  %v3330_v15 = vld [vmem:[%s3519_s7 + $0x264] sm:$0xf]  ;;  %v2700_v19 = vld [vmem:[%s3519_s7 + $0x68] sm:$0xf0]  ;;  %v2690_v21 = vld [vmem:[%s3519_s7 + $0x50] sm:$0xf] }
  0x1f   : > { %v3266_v18 = vld [vmem:[%s3519_s7 + $0x64] sm:$0xf]  ;;  %v3265_v22 = vld [vmem:[%s3519_s7 + $0x54] sm:$0xf0]  ;;  %v3332_v27 = vld [vmem:[%s3519_s7 + $0x274] sm:$0xf] }
  0x20   : > { %v2691_v25 = vor.u32 %v3265_v22, %v2690_v21  ;;  %v2964_v28 = vld [vmem:[%s3519_s7 + $0x278] sm:$0xf0]  ;;  %v3267_v34 = vld [vmem:[%s3519_s7 + $0x64] sm:$0xf0]  ;;  %v2946_v35 = vld [vmem:[%s3519_s7 + $0x250] sm:$0xf] }
  0x21   : > { %1241 = vmatpush.bf16.msra.mxu0 %v3382_v16  ;;  %3394 = vmatpush.bf16.msra.mxu2 %v3382_v16  ;;  %v2956_v16 = vld [vmem:[%s3519_s7 + $0x268] sm:$0xf0]  ;;  %v2708_v31 = vld [vmem:[%s3519_s7 + $0x78] sm:$0xf0]  ;;  %v3270_v39 = vld [vmem:[%s3519_s7 + $0x84] sm:$0xf] }
  0x22   : > { %v2959_v17 = vor.u32 %v3330_v15, %v2956_v16  ;;  %v2716_v40 = vld [vmem:[%s3519_s7 + $0x88] sm:$0xf0]  ;;  %v3269_v46 = vld [vmem:[%s3519_s7 + $0x74] sm:$0xf0]  ;;  %v3331_v49 = vld [vmem:[%s3519_s7 + $0x264] sm:$0xf0] }
  0x23   : > { %v2719_v44 = vor.u32 %v3270_v39, %v2716_v40  ;;  %v3336_v55 = vld [vmem:[%s3519_s7 + $0x294] sm:$0xf]  ;;  %v2980_v56 = vld [vmem:[%s3519_s7 + $0x298] sm:$0xf0]  ;;  %v2714_v59 = vld [vmem:[%s3519_s7 + $0x80] sm:$0xf] }
  0x24   : > { %v2962_v62 = vld [vmem:[%s3519_s7 + $0x270] sm:$0xf]  ;;  %v3333_v63 = vld [vmem:[%s3519_s7 + $0x274] sm:$0xf0]  ;;  %v3631_v0 = vld [vmem:[%s4552_s2] ss:$0 sm:$0xff] }
  0x25   : > { %1242 = vmatpush.bf16.msra.mxu0 %v3381_v20  ;;  %3395 = vmatpush.bf16.msra.mxu2 %v3381_v20  ;;  %v2703_v20 = vor.u32 %v3266_v18, %v2700_v19  ;;  %v2963_v4 = vor.u32 %v3333_v63, %v2962_v62  ;;  %v3639_v6 = vld [vmem:[%s4553_s3] ss:$0 sm:$0xff]  ;;  %v3338_v18 = vld [vmem:[%s3519_s7 + $0x2a4] sm:$0xf]  ;;  %v2988_v19 = vld [vmem:[%s3519_s7 + $0x2a8] sm:$0xf0] }
  0x29   : > { %1243 = vmatpush.bf16.msra.mxu0 %v3380_v24  ;;  %3396 = vmatpush.bf16.msra.mxu2 %v3380_v24  ;;  %v3327_v24 = vld [vmem:[%s3519_s7 + $0x244] sm:$0xf0] }
  0x2a   : > { %3189 = vmatmul.msk.bf16.gmra.mxu1 %vm1039_vm2, %v2663_v23  ;;  %3222 = vmatmul.msk.bf16.gmra.mxu3 %vm1039_vm2, %v2927_v33  ;;  %v2938_v23 = vld [vmem:[%s3519_s7 + $0x240] sm:$0xf] }
  0x2b   : > { %v2939_v26 = vor.u32 %v3327_v24, %v2938_v23  ;;  %v2698_v33 = vld [vmem:[%s3519_s7 + $0x60] sm:$0xf]  ;;  %v2722_v23 = vld [vmem:[%s3519_s7 + $0x90] sm:$0xf]  ;;  %v3273_v24 = vld [vmem:[%s3519_s7 + $0x94] sm:$0xf0] }
  0x2c   : > { %1244 = vmatmul.bf16.vlgmr.msra.gmra.mxu0 %v2651_v29  ;;  %1399 = vmatmul.bf16.vlgmr.msra.gmra.mxu2 %v2899_v30  ;;  %v2967_v29 = vor.u32 %v3332_v27, %v2964_v28  ;;  %v3268_v30 = vld [vmem:[%s3519_s7 + $0x74] sm:$0xf]  ;;  %v2699_v37 = vor.u32 %v3267_v34, %v2698_v33  ;;  %v2970_v27 = vld [vmem:[%s3519_s7 + $0x280] sm:$0xf]  ;;  %v3335_v28 = vld [vmem:[%s3519_s7 + $0x284] sm:$0xf0] }
  0x2d   : > { %v2711_v32 = vor.u32 %v3268_v30, %v2708_v31  ;;  %v2723_v31 = vor.u32 %v3273_v24, %v2722_v23  ;;  %v2971_v34 = vor.u32 %v3335_v28, %v2970_v27  ;;  %v3277_v27 = vld [vmem:[%s3519_s7 + $0xb4] sm:$0xf0] }
  0x3a   : > { %3190 = vmatmul.msk.bf16.gmra.mxu1 %vm1039_vm2, %v2671_v36  ;;  %3223 = vmatmul.msk.bf16.gmra.mxu3 %vm1039_vm2, %v2935_v45  ;;  %v3329_v36 = vld [vmem:[%s3519_s7 + $0x254] sm:$0xf0]  ;;  %v2706_v45 = vld [vmem:[%s3519_s7 + $0x70] sm:$0xf] }
  0x3b   : > { %v2947_v38 = vor.u32 %v3329_v36, %v2946_v35  ;;  %v2707_v50 = vor.u32 %v3269_v46, %v2706_v45 }
  0x3c   : > { %1249 = vmatmul.bf16.gmra.mxu0 %v2659_v41  ;;  %1404 = vmatmul.bf16.gmra.mxu2 %v2907_v42  ;;  %v3334_v41 = vld [vmem:[%s3519_s7 + $0x284] sm:$0xf]  ;;  %v2972_v42 = vld [vmem:[%s3519_s7 + $0x288] sm:$0xf0] }
  0x3d   : > { %v2975_v43 = vor.u32 %v3334_v41, %v2972_v42 }
  0x4a   : > { %3191 = vmatmul.msk.bf16.gmra.mxu1 %vm1039_vm2, %v2679_v48  ;;  %3224 = vmatmul.msk.bf16.gmra.mxu3 %vm1039_vm2, %v2943_v57  ;;  %v2954_v48 = vld [vmem:[%s3519_s7 + $0x260] sm:$0xf]  ;;  %v2983_v57 = vor.u32 %v3336_v55, %v2980_v56 }
  0x4b   : > { %v2955_v51 = vor.u32 %v3331_v49, %v2954_v48  ;;  %v3340_v48 = vld [vmem:[%s3519_s7 + $0x2b4] sm:$0xf]  ;;  %v2996_v49 = vld [vmem:[%s3519_s7 + $0x2b8] sm:$0xf0] }
  0x4c   : > { %1254 = vmatmul.bf16.gmra.mxu0 %v2667_v53  ;;  %1409 = vmatmul.bf16.gmra.mxu2 %v2915_v54  ;;  %v3272_v53 = vld [vmem:[%s3519_s7 + $0x94] sm:$0xf]  ;;  %v2724_v54 = vld [vmem:[%s3519_s7 + $0x98] sm:$0xf0] }
  0x4d   : > { %v2727_v58 = vor.u32 %v3272_v53, %v2724_v54  ;;  %v2730_v53 = vld [vmem:[%s3519_s7 + $0xa0] sm:$0xf]  ;;  %v3275_v54 = vld [vmem:[%s3519_s7 + $0xa4] sm:$0xf0] }
  0x5a   : > { %3192 = vmatmul.msk.bf16.gmra.mxu1 %vm1039_vm2, %v2687_v60  ;;  %3225 = vmatmul.msk.bf16.gmra.mxu3 %vm1039_vm2, %v2951_v5  ;;  %v3271_v60 = vld [vmem:[%s3519_s7 + $0x84] sm:$0xf0] }
  0x5c   : > { %1259 = vmatmul.bf16.gmra.mxu0 %v2675_v1  ;;  %1414 = vmatmul.bf16.gmra.mxu2 %v2923_v2  ;;  %v2715_v1 = vor.u32 %v3271_v60, %v2714_v59 }
  0x6a   : > { %3193 = vmatmul.msk.bf16.gmra.mxu1 %vm1039_vm2, %v2695_v8  ;;  %3226 = vmatmul.msk.bf16.gmra.mxu3 %vm1039_vm2, %v2959_v17  ;;  %v2732_v17 = vld [vmem:[%s3519_s7 + $0xa8] sm:$0xf0] }
  0x6c   : > { %1264 = vmatmul.bf16.gmra.mxu0 %v2683_v13  ;;  %1419 = vmatmul.bf16.gmra.mxu2 %v2931_v14  ;;  %v3274_v14 = vld [vmem:[%s3519_s7 + $0xa4] sm:$0xf] }
  0x6d   : > { %v2735_v22 = vor.u32 %v3274_v14, %v2732_v17 }
  0x7a   : > { %3194 = vmatmul.msk.bf16.gmra.mxu1 %vm1039_vm2, %v2703_v20  ;;  %3227 = vmatmul.msk.bf16.gmra.mxu3 %vm1039_vm2, %v2967_v29  ;;  %v2991_v20 = vor.u32 %v3338_v18, %v2988_v19  ;;  %v2748_v19 = vld [vmem:[%s3519_s7 + $0xc8] sm:$0xf0] }
  0x7c   : > { %1269 = vmatmul.bf16.gmra.mxu0 %v2691_v25  ;;  %1424 = vmatmul.bf16.gmra.mxu2 %v2939_v26 }
  0x8a   : > { %3195 = vmatmul.msk.bf16.gmra.mxu1 %vm1039_vm2, %v2711_v32  ;;  %3228 = vmatmul.msk.bf16.gmra.mxu3 %vm1039_vm2, %v2975_v43 }
  0x8c   : > { %1274 = vmatmul.bf16.gmra.mxu0 %v2699_v37  ;;  %1429 = vmatmul.bf16.gmra.mxu2 %v2947_v38 }
  0x97   : > { %v1569_v47 = vpop.f32.mrf.mxu1 }
  0x9a   : > { %3196 = vmatmul.msk.bf16.gmra.mxu1 %vm1039_vm2, %v2719_v44  ;;  %3229 = vmatmul.msk.bf16.gmra.mxu3 %vm1039_vm2, %v2983_v57  ;;  %v3276_v44 = vld [vmem:[%s3519_s7 + $0xb4] sm:$0xf]  ;;  %v2978_v57 = vld [vmem:[%s3519_s7 + $0x290] sm:$0xf] }
  0x9c   : > { %1279 = vmatmul.bf16.gmra.mxu0 %v2707_v50  ;;  %1434 = vmatmul.bf16.gmra.mxu2 %v2955_v51  ;;  %v2999_v50 = vor.u32 %v3340_v48, %v2996_v49 }
  0x9d   : > { %v3633_v2 = vpop.f32.mrf.mxu3 }
  0x9f   : > { %v1571_v52 = vpop.f32.mrf.mxu1 }
  0xa5   : > { %v3646_v12 = vpop.f32.mrf.mxu3 }
  0xa7   : > { %v1574_v61 = vpop.f32.mrf.mxu1 }
  0xa9   : > { %v1245_v3 = vpop.f32.mrf.mxu0 }
  0xaa   : > { %3197 = vmatmul.msk.bf16.gmra.mxu1 %vm1039_vm2, %v2727_v58  ;;  %v1570_v5 = vadd.f32 %v1569_v47, %v1245_v3  ;;  %3230 = vmatmul.msk.bf16.gmra.mxu3 %vm1039_vm2, %v2991_v20  ;;  %v2740_v47 = vld [vmem:[%s3519_s7 + $0xb8] sm:$0xf0]  ;;  %v3337_v58 = vld [vmem:[%s3519_s7 + $0x294] sm:$0xf0]  ;;  %v3342_v20 = vld [vmem:[%s3519_s7 + $0x2c4] sm:$0xf] }
  0xac   : > { %v1888_v7 = vmul.f32 %v3631_v0, %v1570_v5  ;;  %1284 = vmatmul.bf16.gmra.mxu0 %v2715_v1  ;;  %1439 = vmatmul.bf16.gmra.mxu2 %v2963_v4  ;;  %v2979_v1 = vor.u32 %v3337_v58, %v2978_v57  ;;  %v3280_v58 = vld [vmem:[%s3519_s7 + $0xd4] sm:$0xf] }
  0xad   : > { %v3668_v32 = vpop.f32.mrf.mxu3 }
  0xae   : > { %v2018_v8 = vadd.f32 %v3639_v6, %v1888_v7 }
  0xaf   : > { %v1576_v9 = vpop.f32.mrf.mxu1  ;;  %v3644_v11 = vpop.f32.mrf.mxu2 }
  0xb0   : > { %v2144_v10 = vmax.f32 %v2018_v8, 0.0 }
  0xb1   : > { %v1247_v13 = vpop.f32.mrf.mxu0 }
  0xb2   : > { %v2270_v15 = vpack.c.bf16 %v2144_v10, %v2144_v10  ;;  %v1572_v16 = vadd.f32 %v1571_v52, %v1247_v13  ;;  %v2743_v52 = vor.u32 %v3276_v44, %v2740_v47 }
  0xb4   : > { %2397 = vst.msk [vmem:[%s3651_s29] sm:$0xf] %vm2396_vm3, %v2270_v15  ;;  %v1889_v21 = vmul.f32 %v3631_v0, %v1572_v16  ;;  %v3278_v16 = vld [vmem:[%s3519_s7 + $0xc4] sm:$0xf] }
  0xb5   : > { %v3677_v42 = vpop.f32.mrf.mxu3 }
  0xb6   : > { %v2019_v25 = vadd.f32 %v3639_v6, %v1889_v21  ;;  %v3004_v21 = vld [vmem:[%s3519_s7 + $0x2c8] sm:$0xf0] }
  0xb7   : > { %v1579_v26 = vpop.f32.mrf.mxu1  ;;  %v3666_v30 = vpop.f32.mrf.mxu2  ;;  %v3007_v23 = vor.u32 %v3342_v20, %v3004_v21 }
  0xb8   : > { %v2145_v29 = vmax.f32 %v2019_v25, 0.0 }
  0xb9   : > { %v1250_v33 = vpop.f32.mrf.mxu0 }
  0xba   : > { %3198 = vmatmul.msk.bf16.gmra.mxu1 %vm1039_vm2, %v2735_v22  ;;  %v2271_v35 = vpack.c.bf16 %v2145_v29, %v2145_v29  ;;  %v1575_v36 = vadd.f32 %v1574_v61, %v1250_v33  ;;  %3231 = vmatmul.msk.bf16.gmra.mxu3 %vm1039_vm2, %v2999_v50  ;;  %v2731_v61 = vor.u32 %v3275_v54, %v2730_v53  ;;  %v3339_v33 = vld [vmem:[%s3519_s7 + $0x2a4] sm:$0xf0] }
  0xbc   : > { %2398 = vst.msk [vmem:[%s3651_s29 + $0x4] sm:$0xf] %vm2396_vm3, %v2271_v35  ;;  %v1890_v37 = vmul.f32 %v3631_v0, %v1575_v36  ;;  %1289 = vmatmul.bf16.gmra.mxu0 %v2723_v31  ;;  %1444 = vmatmul.bf16.gmra.mxu2 %v2971_v34  ;;  %v2986_v31 = vld [vmem:[%s3519_s7 + $0x2a0] sm:$0xf] }
  0xbd   : > { %v3694_v62 = vpop.f32.mrf.mxu3  ;;  %v2987_v44 = vor.u32 %v3339_v33, %v2986_v31 }
  0xbe   : > { %v2020_v38 = vadd.f32 %v3639_v6, %v1890_v37 }
  0xbf   : > { %v1581_v39 = vpop.f32.mrf.mxu1  ;;  %v3675_v41 = vpop.f32.mrf.mxu2 }
  0xc0   : > { %v2146_v40 = vmax.f32 %v2020_v38, 0.0 }
  0xc1   : > { %v1252_v43 = vpop.f32.mrf.mxu0 }
  0xc2   : > { %v2272_v45 = vpack.c.bf16 %v2146_v40, %v2146_v40  ;;  %v1577_v46 = vadd.f32 %v1576_v9, %v1252_v43 }
  0xc4   : > { %2399 = vst.msk [vmem:[%s3651_s29 + $0x8] sm:$0xf] %vm2396_vm3, %v2272_v45  ;;  %v1891_v51 = vmul.f32 %v3631_v0, %v1577_v46 }
  0xc5   : > { %v3701_v13 = vpop.f32.mrf.mxu3 }
  0xc6   : > { %v2021_v55 = vadd.f32 %v3639_v6, %v1891_v51 }
  0xc7   : > { %v1584_v56 = vpop.f32.mrf.mxu1  ;;  %v3692_v60 = vpop.f32.mrf.mxu2 }
  0xc8   : > { %v2147_v59 = vmax.f32 %v2021_v55, 0.0 }
  0xc9   : > { %v1255_v63 = vpop.f32.mrf.mxu0 }
  0xca   : > { %3199 = vmatmul.msk.bf16.gmra.mxu1 %vm1039_vm2, %v2743_v52  ;;  %v2273_v3 = vpack.c.bf16 %v2147_v59, %v2147_v59  ;;  %v1580_v4 = vadd.f32 %v1579_v26, %v1255_v63  ;;  %v2751_v26 = vor.u32 %v3278_v16, %v2748_v19  ;;  %3232 = vmatmul.msk.bf16.gmra.mxu3 %vm1039_vm2, %v3007_v23  ;;  %v2756_v63 = vld [vmem:[%s3519_s7 + $0xd8] sm:$0xf0]  ;;  %v2994_v16 = vld [vmem:[%s3519_s7 + $0x2b0] sm:$0xf] }
  0xcc   : > { %2400 = vst.msk [vmem:[%s3651_s29 + $0xc] sm:$0xf] %vm2396_vm3, %v2273_v3  ;;  %v1892_v5 = vmul.f32 %v3631_v0, %v1580_v4  ;;  %1294 = vmatmul.bf16.gmra.mxu0 %v2731_v61  ;;  %1449 = vmatmul.bf16.gmra.mxu2 %v2979_v1  ;;  %v3344_v1 = vld [vmem:[%s3519_s7 + $0x2d4] sm:$0xf]  ;;  %v3012_v3 = vld [vmem:[%s3519_s7 + $0x2d8] sm:$0xf0] }
  0xcd   : > { %v3719_v38 = vpop.f32.mrf.mxu3 }
  0xce   : > { %v2022_v7 = vadd.f32 %v3639_v6, %v1892_v5  ;;  %v3015_v5 = vor.u32 %v3344_v1, %v3012_v3 }
  0xcf   : > { %v1586_v8 = vpop.f32.mrf.mxu1  ;;  %v1410_v10 = vpop.f32.mrf.mxu2 }
  0xd0   : > { %v2148_v9 = vmax.f32 %v2022_v7, 0.0  ;;  %v1735_v14 = vadd.f32 %v3633_v2, %v1410_v10  ;;  %v2738_v2 = vld [vmem:[%s3519_s7 + $0xb0] sm:$0xf]  ;;  %v2746_v10 = vld [vmem:[%s3519_s7 + $0xc0] sm:$0xf] }
  0xd1   : > { %v1257_v15 = vpop.f32.mrf.mxu0  ;;  %v2739_v37 = vor.u32 %v3277_v27, %v2738_v2 }
  0xd2   : > { %v2274_v17 = vpack.c.bf16 %v2148_v9, %v2148_v9  ;;  %v1582_v18 = vadd.f32 %v1581_v39, %v1257_v15  ;;  %v1954_v22 = vmul.f32 %v3631_v0, %v1735_v14  ;;  %v2759_v9 = vor.u32 %v3280_v58, %v2756_v63  ;;  %v3279_v14 = vld [vmem:[%s3519_s7 + $0xc4] sm:$0xf0]  ;;  %v3002_v58 = vld [vmem:[%s3519_s7 + $0x2c0] sm:$0xf] }
  0xd3   : > { %v2747_v21 = vor.u32 %v3279_v14, %v2746_v10 }
  0xd4   : > { %2401 = vst.msk [vmem:[%s3651_s29 + $0x10] sm:$0xf] %vm2396_vm3, %v2274_v17  ;;  %v1893_v24 = vmul.f32 %v3631_v0, %v1582_v18  ;;  %v2084_v25 = vadd.f32 %v3639_v6, %v1954_v22  ;;  %v3341_v17 = vld [vmem:[%s3519_s7 + $0x2b4] sm:$0xf0] }
  0xd5   : > { %v3731_v54 = vpop.f32.mrf.mxu3 }
  0xd6   : > { %v2023_v28 = vadd.f32 %v3639_v6, %v1893_v24  ;;  %v2210_v34 = vmax.f32 %v2084_v25, 0.0 }
  0xd7   : > { %v1589_v29 = vpop.f32.mrf.mxu1  ;;  %v1412_v36 = vpop.f32.mrf.mxu2 }
  0xd8   : > { %v2149_v35 = vmax.f32 %v2023_v28, 0.0  ;;  %v2336_v39 = vpack.c.bf16 %v2210_v34, %v2210_v34  ;;  %v1737_v40 = vadd.f32 %v3646_v12, %v1412_v36 }
  0xd9   : > { %v1260_v43 = vpop.f32.mrf.mxu0 }
  0xda   : > { %3200 = vmatmul.msk.bf16.gmra.mxu1 %vm1039_vm2, %v2751_v26  ;;  %v2275_v45 = vpack.c.bf16 %v2149_v35, %v2149_v35  ;;  %v1585_v46 = vadd.f32 %v1584_v56, %v1260_v43  ;;  %2463 = vst.msk [vmem:[%s3651_s29 + $0x108] sm:$0xf] %vm2396_vm3, %v2336_v39  ;;  %v1955_v47 = vmul.f32 %v3631_v0, %v1737_v40 }
  0xdb   : > { %3233 = vmatmul.msk.bf16.gmra.mxu3 %vm1039_vm2, %v3015_v5  ;;  %v2995_v26 = vor.u32 %v3341_v17, %v2994_v16 }
  0xdc   : > { %2402 = vst.msk [vmem:[%s3651_s29 + $0x14] sm:$0xf] %vm2396_vm3, %v2275_v45  ;;  %v1894_v48 = vmul.f32 %v3631_v0, %v1585_v46  ;;  %1299 = vmatmul.bf16.gmra.mxu0 %v2739_v37  ;;  %v2085_v12 = vadd.f32 %v3639_v6, %v1955_v47  ;;  %1454 = vmatmul.bf16.gmra.mxu2 %v2987_v44  ;;  %v3282_v44 = vld [vmem:[%s3519_s7 + $0xe4] sm:$0xf]  ;;  %v2764_v47 = vld [vmem:[%s3519_s7 + $0xe8] sm:$0xf0] }
  0xdd   : > { %v3751_v22 = vpop.f32.mrf.mxu3 }
  0xde   : > { %v2024_v49 = vadd.f32 %v3639_v6, %v1894_v48  ;;  %v2211_v51 = vmax.f32 %v2085_v12, 0.0  ;;  %v3346_v48 = vld [vmem:[%s3519_s7 + $0x2e4] sm:$0xf]  ;;  %v3020_v12 = vld [vmem:[%s3519_s7 + $0x2e8] sm:$0xf0] }
  0xdf   : > { %v1591_v50 = vpop.f32.mrf.mxu1  ;;  %v1415_v53 = vpop.f32.mrf.mxu2 }
  0xe0   : > { %v2150_v52 = vmax.f32 %v2024_v49, 0.0  ;;  %v2337_v55 = vpack.c.bf16 %v2211_v51, %v2211_v51  ;;  %v1740_v56 = vadd.f32 %v3668_v32, %v1415_v53  ;;  %v3023_v51 = vor.u32 %v3346_v48, %v3020_v12 }
  0xe1   : > { %v1262_v57 = vpop.f32.mrf.mxu0  ;;  %v2767_v53 = vor.u32 %v3282_v44, %v2764_v47  ;;  %v3010_v44 = vld [vmem:[%s3519_s7 + $0x2d0] sm:$0xf] }
  0xe2   : > { %v2276_v59 = vpack.c.bf16 %v2150_v52, %v2150_v52  ;;  %v1587_v61 = vadd.f32 %v1586_v8, %v1262_v57  ;;  %2464 = vst.msk [vmem:[%s3651_s29 + $0x10c] sm:$0xf] %vm2396_vm3, %v2337_v55  ;;  %v1956_v4 = vmul.f32 %v3631_v0, %v1740_v56  ;;  %v2754_v55 = vld [vmem:[%s3519_s7 + $0xd0] sm:$0xf]  ;;  %v3281_v56 = vld [vmem:[%s3519_s7 + $0xd4] sm:$0xf0] }
  0xe3   : > { %v2755_v3 = vor.u32 %v3281_v56, %v2754_v55 }
  0xe4   : > { %2403 = vst.msk [vmem:[%s3651_s29 + $0x18] sm:$0xf] %vm2396_vm3, %v2276_v59  ;;  %v1895_v7 = vmul.f32 %v3631_v0, %v1587_v61  ;;  %v2086_v32 = vadd.f32 %v3639_v6, %v1956_v4  ;;  %v3343_v59 = vld [vmem:[%s3519_s7 + $0x2c4] sm:$0xf0] }
  0xe5   : > { %v3763_v37 = vpop.f32.mrf.mxu3 }
  0xe6   : > { %v2025_v8 = vadd.f32 %v3639_v6, %v1895_v7  ;;  %v2212_v18 = vmax.f32 %v2086_v32, 0.0 }
  0xe7   : > { %v1594_v15 = vpop.f32.mrf.mxu1  ;;  %v1417_v20 = vpop.f32.mrf.mxu2 }
  0xe8   : > { %v2151_v19 = vmax.f32 %v2025_v8, 0.0  ;;  %v2338_v23 = vpack.c.bf16 %v2212_v18, %v2212_v18  ;;  %v1742_v24 = vadd.f32 %v3677_v42, %v1417_v20 }
  0xe9   : > { %v1265_v25 = vpop.f32.mrf.mxu0 }
  0xea   : > { %3201 = vmatmul.msk.bf16.gmra.mxu1 %vm1039_vm2, %v2759_v9  ;;  %v2277_v2 = vpack.c.bf16 %v2151_v19, %v2151_v19  ;;  %v1590_v27 = vadd.f32 %v1589_v29, %v1265_v25  ;;  %2465 = vst.msk [vmem:[%s3651_s29 + $0x110] sm:$0xf] %vm2396_vm3, %v2338_v23  ;;  %v1957_v28 = vmul.f32 %v3631_v0, %v1742_v24 }
  0xeb   : > { %3234 = vmatmul.msk.bf16.gmra.mxu3 %vm1039_vm2, %v3023_v51  ;;  %v3003_v9 = vor.u32 %v3343_v59, %v3002_v58 }
  0xec   : > { %2404 = vst.msk [vmem:[%s3651_s29 + $0x1c] sm:$0xf] %vm2396_vm3, %v2277_v2  ;;  %v1896_v31 = vmul.f32 %v3631_v0, %v1590_v27  ;;  %1304 = vmatmul.bf16.gmra.mxu0 %v2747_v21  ;;  %v2087_v42 = vadd.f32 %v3639_v6, %v1957_v28  ;;  %1459 = vmatmul.bf16.gmra.mxu2 %v2995_v26  ;;  %v3284_v26 = vld [vmem:[%s3519_s7 + $0xf4] sm:$0xf]  ;;  %v2772_v28 = vld [vmem:[%s3519_s7 + $0xf8] sm:$0xf0] }
  0xed   : > { %v3783_v4 = vpop.f32.mrf.mxu3 }
  0xee   : > { %v2026_v33 = vadd.f32 %v3639_v6, %v1896_v31  ;;  %v2213_v34 = vmax.f32 %v2087_v42, 0.0  ;;  %v3348_v31 = vld [vmem:[%s3519_s7 + $0x2f4] sm:$0xf]  ;;  %v3028_v42 = vld [vmem:[%s3519_s7 + $0x2f8] sm:$0xf0] }
  0xef   : > { %v1596_v29 = vpop.f32.mrf.mxu1  ;;  %v1420_v36 = vpop.f32.mrf.mxu2 }
  0xf0   : > { %v2152_v35 = vmax.f32 %v2026_v33, 0.0  ;;  %v2339_v39 = vpack.c.bf16 %v2213_v34, %v2213_v34  ;;  %v1745_v40 = vadd.f32 %v3694_v62, %v1420_v36  ;;  %v3031_v34 = vor.u32 %v3348_v31, %v3028_v42 }
  0xf1   : > { %v1267_v43 = vpop.f32.mrf.mxu0  ;;  %v2775_v36 = vor.u32 %v3284_v26, %v2772_v28  ;;  %v3018_v26 = vld [vmem:[%s3519_s7 + $0x2e0] sm:$0xf] }
  0xf2   : > { %v2278_v45 = vpack.c.bf16 %v2152_v35, %v2152_v35  ;;  %v1592_v46 = vadd.f32 %v1591_v50, %v1267_v43  ;;  %2466 = vst.msk [vmem:[%s3651_s29 + $0x114] sm:$0xf] %vm2396_vm3, %v2339_v39  ;;  %v1958_v49 = vmul.f32 %v3631_v0, %v1745_v40  ;;  %v2762_v39 = vld [vmem:[%s3519_s7 + $0xe0] sm:$0xf]  ;;  %v3283_v40 = vld [vmem:[%s3519_s7 + $0xe4] sm:$0xf0] }
  0xf3   : > { %v2763_v12 = vor.u32 %v3283_v40, %v2762_v39 }
  0xf4   : > { %2405 = vst.msk [vmem:[%s3651_s29 + $0x20] sm:$0xf] %vm2396_vm3, %v2278_v45  ;;  %v1897_v52 = vmul.f32 %v3631_v0, %v1592_v46  ;;  %v2088_v62 = vadd.f32 %v3639_v6, %v1958_v49  ;;  %v3345_v45 = vld [vmem:[%s3519_s7 + $0x2d4] sm:$0xf0] }
  0xf5   : > { %v3795_v21 = vpop.f32.mrf.mxu3 }
  0xf6   : > { %v2027_v50 = vadd.f32 %v3639_v6, %v1897_v52  ;;  %v2214_v61 = vmax.f32 %v2088_v62, 0.0 }
  0xf7   : > { %v1599_v57 = vpop.f32.mrf.mxu1  ;;  %v1422_v1 = vpop.f32.mrf.mxu2 }
  0xf8   : > { %v2153_v63 = vmax.f32 %v2027_v50, 0.0  ;;  %v2340_v5 = vpack.c.bf16 %v2214_v61, %v2214_v61  ;;  %v1747_v7 = vadd.f32 %v3701_v13, %v1422_v1 }
  0xf9   : > { %v1270_v32 = vpop.f32.mrf.mxu0 }
  0xfa   : > { %3202 = vmatmul.msk.bf16.gmra.mxu1 %vm1039_vm2, %v2767_v53  ;;  %v2279_v10 = vpack.c.bf16 %v2153_v63, %v2153_v63  ;;  %v1595_v14 = vadd.f32 %v1594_v15, %v1270_v32  ;;  %2467 = vst.msk [vmem:[%s3651_s29 + $0x118] sm:$0xf] %vm2396_vm3, %v2340_v5  ;;  %v1959_v8 = vmul.f32 %v3631_v0, %v1747_v7 }
  0xfb   : > { %3235 = vmatmul.msk.bf16.gmra.mxu3 %vm1039_vm2, %v3031_v34  ;;  %v3011_v53 = vor.u32 %v3345_v45, %v3010_v44 }
  0xfc   : > { %2406 = vst.msk [vmem:[%s3651_s29 + $0x24] sm:$0xf] %vm2396_vm3, %v2279_v10  ;;  %v1898_v16 = vmul.f32 %v3631_v0, %v1595_v14  ;;  %1309 = vmatmul.bf16.gmra.mxu0 %v2755_v3  ;;  %v2089_v13 = vadd.f32 %v3639_v6, %v1959_v8  ;;  %1464 = vmatmul.bf16.gmra.mxu2 %v3003_v9  ;;  %v3286_v9 = vld [vmem:[%s3519_s7 + $0x104] sm:$0xf]  ;;  %v2780_v8 = vld [vmem:[%s3519_s7 + $0x108] sm:$0xf0] }
  0xfd   : > { %v3815_v49 = vpop.f32.mrf.mxu3 }
  0xfe   : > { %v2028_v17 = vadd.f32 %v3639_v6, %v1898_v16  ;;  %v2215_v18 = vmax.f32 %v2089_v13, 0.0  ;;  %v3350_v16 = vld [vmem:[%s3519_s7 + $0x304] sm:$0xf]  ;;  %v3036_v13 = vld [vmem:[%s3519_s7 + $0x308] sm:$0xf0] }
  0xff   : > { %v1601_v15 = vpop.f32.mrf.mxu1  ;;  %v1425_v20 = vpop.f32.mrf.mxu2 }
 0x100   : > { %v2154_v19 = vmax.f32 %v2028_v17, 0.0  ;;  %v2341_v23 = vpack.c.bf16 %v2215_v18, %v2215_v18  ;;  %v1750_v24 = vadd.f32 %v3719_v38, %v1425_v20  ;;  %v3039_v18 = vor.u32 %v3350_v16, %v3036_v13 }
 0x101   : > { %v1272_v25 = vpop.f32.mrf.mxu0  ;;  %v2783_v20 = vor.u32 %v3286_v9, %v2780_v8  ;;  %v3026_v9 = vld [vmem:[%s3519_s7 + $0x2f0] sm:$0xf] }
 0x102   : > { %v2280_v2 = vpack.c.bf16 %v2154_v19, %v2154_v19  ;;  %v1597_v27 = vadd.f32 %v1596_v29, %v1272_v25  ;;  %2468 = vst.msk [vmem:[%s3651_s29 + $0x11c] sm:$0xf] %vm2396_vm3, %v2341_v23  ;;  %v1960_v33 = vmul.f32 %v3631_v0, %v1750_v24  ;;  %v2770_v23 = vld [vmem:[%s3519_s7 + $0xf0] sm:$0xf]  ;;  %v3285_v24 = vld [vmem:[%s3519_s7 + $0xf4] sm:$0xf0] }
 0x103   : > { %v2771_v42 = vor.u32 %v3285_v24, %v2770_v23 }
 0x104   : > { %2407 = vst.msk [vmem:[%s3651_s29 + $0x28] sm:$0xf] %vm2396_vm3, %v2280_v2  ;;  %v1899_v35 = vmul.f32 %v3631_v0, %v1597_v27  ;;  %v2090_v38 = vadd.f32 %v3639_v6, %v1960_v33  ;;  %v3347_v2 = vld [vmem:[%s3519_s7 + $0x2e4] sm:$0xf0] }
 0x105   : > { %v3827_v3 = vpop.f32.mrf.mxu3 }
 0x106   : > { %v2029_v29 = vadd.f32 %v3639_v6, %v1899_v35  ;;  %v2216_v46 = vmax.f32 %v2090_v38, 0.0 }
 0x107   : > { %v1604_v43 = vpop.f32.mrf.mxu1  ;;  %v1427_v48 = vpop.f32.mrf.mxu2 }
 0x108   : > { %v2155_v47 = vmax.f32 %v2029_v29, 0.0  ;;  %v2342_v51 = vpack.c.bf16 %v2216_v46, %v2216_v46  ;;  %v1752_v52 = vadd.f32 %v3731_v54, %v1427_v48 }
 0x109   : > { %v1275_v62 = vpop.f32.mrf.mxu0 }
 0x10a   : > { %3203 = vmatmul.msk.bf16.gmra.mxu1 %vm1039_vm2, %v2775_v36  ;;  %v2281_v55 = vpack.c.bf16 %v2155_v47, %v2155_v47  ;;  %v1600_v56 = vadd.f32 %v1599_v57, %v1275_v62  ;;  %2469 = vst.msk [vmem:[%s3651_s29 + $0x120] sm:$0xf] %vm2396_vm3, %v2342_v51  ;;  %v1961_v50 = vmul.f32 %v3631_v0, %v1752_v52 }
 0x10b   : > { %3236 = vmatmul.msk.bf16.gmra.mxu3 %vm1039_vm2, %v3039_v18  ;;  %v3019_v36 = vor.u32 %v3347_v2, %v3018_v26 }
 0x10c   : > { %2408 = vst.msk [vmem:[%s3651_s29 + $0x2c] sm:$0xf] %vm2396_vm3, %v2281_v55  ;;  %v1900_v58 = vmul.f32 %v3631_v0, %v1600_v56  ;;  %1314 = vmatmul.bf16.gmra.mxu0 %v2763_v12  ;;  %v2091_v54 = vadd.f32 %v3639_v6, %v1961_v50  ;;  %1469 = vmatmul.bf16.gmra.mxu2 %v3011_v53  ;;  %v3288_v53 = vld [vmem:[%s3519_s7 + $0x114] sm:$0xf]  ;;  %v2788_v50 = vld [vmem:[%s3519_s7 + $0x118] sm:$0xf0] }
 0x10d   : > { %v3847_v33 = vpop.f32.mrf.mxu3 }
 0x10e   : > { %v2030_v59 = vadd.f32 %v3639_v6, %v1900_v58  ;;  %v2217_v61 = vmax.f32 %v2091_v54, 0.0  ;;  %v3352_v58 = vld [vmem:[%s3519_s7 + $0x314] sm:$0xf]  ;;  %v3044_v54 = vld [vmem:[%s3519_s7 + $0x318] sm:$0xf0] }
 0x10f   : > { %v1606_v57 = vpop.f32.mrf.mxu1  ;;  %v1430_v1 = vpop.f32.mrf.mxu2 }
 0x110   : > { %v2156_v63 = vmax.f32 %v2030_v59, 0.0  ;;  %v2343_v5 = vpack.c.bf16 %v2217_v61, %v2217_v61  ;;  %v1755_v7 = vadd.f32 %v3751_v22, %v1430_v1  ;;  %v3047_v61 = vor.u32 %v3352_v58, %v3044_v54 }
 0x111   : > { %v1277_v32 = vpop.f32.mrf.mxu0  ;;  %v2791_v1 = vor.u32 %v3288_v53, %v2788_v50  ;;  %v3034_v53 = vld [vmem:[%s3519_s7 + $0x300] sm:$0xf] }
 0x112   : > { %v2282_v10 = vpack.c.bf16 %v2156_v63, %v2156_v63  ;;  %v1602_v14 = vadd.f32 %v1601_v15, %v1277_v32  ;;  %2470 = vst.msk [vmem:[%s3651_s29 + $0x124] sm:$0xf] %vm2396_vm3, %v2343_v5  ;;  %v1962_v17 = vmul.f32 %v3631_v0, %v1755_v7  ;;  %v2778_v5 = vld [vmem:[%s3519_s7 + $0x100] sm:$0xf]  ;;  %v3287_v7 = vld [vmem:[%s3519_s7 + $0x104] sm:$0xf0] }
 0x113   : > { %v2779_v13 = vor.u32 %v3287_v7, %v2778_v5 }
 0x114   : > { %2409 = vst.msk [vmem:[%s3651_s29 + $0x30] sm:$0xf] %vm2396_vm3, %v2282_v10  ;;  %v1901_v19 = vmul.f32 %v3631_v0, %v1602_v14  ;;  %v2092_v22 = vadd.f32 %v3639_v6, %v1962_v17  ;;  %v3349_v10 = vld [vmem:[%s3519_s7 + $0x2f4] sm:$0xf0] }
 0x115   : > { %v3859_v12 = vpop.f32.mrf.mxu3 }
 0x116   : > { %v2031_v15 = vadd.f32 %v3639_v6, %v1901_v19  ;;  %v2218_v27 = vmax.f32 %v2092_v22, 0.0 }
 0x117   : > { %v1609_v25 = vpop.f32.mrf.mxu1  ;;  %v1432_v31 = vpop.f32.mrf.mxu2 }
 0x118   : > { %v2157_v28 = vmax.f32 %v2031_v15, 0.0  ;;  %v2344_v34 = vpack.c.bf16 %v2218_v27, %v2218_v27  ;;  %v1757_v35 = vadd.f32 %v3763_v37, %v1432_v31 }
 0x119   : > { %v1280_v38 = vpop.f32.mrf.mxu0 }
 0x11a   : > { %3204 = vmatmul.msk.bf16.gmra.mxu1 %vm1039_vm2, %v2783_v20  ;;  %v2283_v39 = vpack.c.bf16 %v2157_v28, %v2157_v28  ;;  %v1605_v40 = vadd.f32 %v1604_v43, %v1280_v38  ;;  %2471 = vst.msk [vmem:[%s3651_s29 + $0x128] sm:$0xf] %vm2396_vm3, %v2344_v34  ;;  %v1963_v29 = vmul.f32 %v3631_v0, %v1757_v35 }
 0x11b   : > { %3237 = vmatmul.msk.bf16.gmra.mxu3 %vm1039_vm2, %v3047_v61  ;;  %v3027_v20 = vor.u32 %v3349_v10, %v3026_v9 }
 0x11c   : > { %2410 = vst.msk [vmem:[%s3651_s29 + $0x34] sm:$0xf] %vm2396_vm3, %v2283_v39  ;;  %v1902_v44 = vmul.f32 %v3631_v0, %v1605_v40  ;;  %1319 = vmatmul.bf16.gmra.mxu0 %v2771_v42  ;;  %v2093_v37 = vadd.f32 %v3639_v6, %v1963_v29  ;;  %1474 = vmatmul.bf16.gmra.mxu2 %v3019_v36  ;;  %v3290_v36 = vld [vmem:[%s3519_s7 + $0x124] sm:$0xf]  ;;  %v2796_v29 = vld [vmem:[%s3519_s7 + $0x128] sm:$0xf0] }
 0x11d   : > { %v3879_v17 = vpop.f32.mrf.mxu3 }
 0x11e   : > { %v2032_v45 = vadd.f32 %v3639_v6, %v1902_v44  ;;  %v2219_v46 = vmax.f32 %v2093_v37, 0.0  ;;  %v3354_v44 = vld [vmem:[%s3519_s7 + $0x324] sm:$0xf]  ;;  %v3052_v37 = vld [vmem:[%s3519_s7 + $0x328] sm:$0xf0] }
 0x11f   : > { %v1611_v43 = vpop.f32.mrf.mxu1  ;;  %v1435_v48 = vpop.f32.mrf.mxu2 }
 0x120   : > { %v2158_v47 = vmax.f32 %v2032_v45, 0.0  ;;  %v2345_v51 = vpack.c.bf16 %v2219_v46, %v2219_v46  ;;  %v1760_v52 = vadd.f32 %v3783_v4, %v1435_v48  ;;  %v3055_v46 = vor.u32 %v3354_v44, %v3052_v37 }
 0x121   : > { %v1282_v62 = vpop.f32.mrf.mxu0  ;;  %v2799_v48 = vor.u32 %v3290_v36, %v2796_v29  ;;  %v3042_v36 = vld [vmem:[%s3519_s7 + $0x310] sm:$0xf] }
 0x122   : > { %v2284_v55 = vpack.c.bf16 %v2158_v47, %v2158_v47  ;;  %v1607_v56 = vadd.f32 %v1606_v57, %v1282_v62  ;;  %2472 = vst.msk [vmem:[%s3651_s29 + $0x12c] sm:$0xf] %vm2396_vm3, %v2345_v51  ;;  %v1964_v59 = vmul.f32 %v3631_v0, %v1760_v52  ;;  %v2786_v51 = vld [vmem:[%s3519_s7 + $0x110] sm:$0xf]  ;;  %v3289_v52 = vld [vmem:[%s3519_s7 + $0x114] sm:$0xf0] }
 0x123   : > { %v2787_v54 = vor.u32 %v3289_v52, %v2786_v51 }
 0x124   : > { %2411 = vst.msk [vmem:[%s3651_s29 + $0x38] sm:$0xf] %vm2396_vm3, %v2284_v55  ;;  %v1903_v63 = vmul.f32 %v3631_v0, %v1607_v56  ;;  %v2094_v4 = vadd.f32 %v3639_v6, %v1964_v59  ;;  %v3351_v55 = vld [vmem:[%s3519_s7 + $0x304] sm:$0xf0] }
 0x125   : > { %v3891_v42 = vpop.f32.mrf.mxu3 }
 0x126   : > { %v2033_v57 = vadd.f32 %v3639_v6, %v1903_v63  ;;  %v2220_v14 = vmax.f32 %v2094_v4, 0.0 }
 0x127   : > { %v1614_v32 = vpop.f32.mrf.mxu1  ;;  %v1437_v16 = vpop.f32.mrf.mxu2 }
 0x128   : > { %v2159_v8 = vmax.f32 %v2033_v57, 0.0  ;;  %v2346_v18 = vpack.c.bf16 %v2220_v14, %v2220_v14  ;;  %v1762_v19 = vadd.f32 %v3795_v21, %v1437_v16 }
 0x129   : > { %v1285_v22 = vpop.f32.mrf.mxu0 }
 0x12a   : > { %3205 = vmatmul.msk.bf16.gmra.mxu1 %vm1039_vm2, %v2791_v1  ;;  %v2285_v23 = vpack.c.bf16 %v2159_v8, %v2159_v8  ;;  %v1610_v24 = vadd.f32 %v1609_v25, %v1285_v22  ;;  %2473 = vst.msk [vmem:[%s3651_s29 + $0x130] sm:$0xf] %vm2396_vm3, %v2346_v18  ;;  %v1965_v15 = vmul.f32 %v3631_v0, %v1762_v19 }
 0x12b   : > { %3238 = vmatmul.msk.bf16.gmra.mxu3 %vm1039_vm2, %v3055_v46  ;;  %v3035_v1 = vor.u32 %v3351_v55, %v3034_v53 }
 0x12c   : > { %2412 = vst.msk [vmem:[%s3651_s29 + $0x3c] sm:$0xf] %vm2396_vm3, %v2285_v23  ;;  %v1904_v26 = vmul.f32 %v3631_v0, %v1610_v24  ;;  %1324 = vmatmul.bf16.gmra.mxu0 %v2779_v13  ;;  %v2095_v21 = vadd.f32 %v3639_v6, %v1965_v15  ;;  %1479 = vmatmul.bf16.gmra.mxu2 %v3027_v20  ;;  %v3292_v20 = vld [vmem:[%s3519_s7 + $0x134] sm:$0xf]  ;;  %v2804_v15 = vld [vmem:[%s3519_s7 + $0x138] sm:$0xf0] }
 0x12d   : > { %v3911_v59 = vpop.f32.mrf.mxu3 }
 0x12e   : > { %v2034_v2 = vadd.f32 %v3639_v6, %v1904_v26  ;;  %v2221_v27 = vmax.f32 %v2095_v21, 0.0  ;;  %v3356_v26 = vld [vmem:[%s3519_s7 + $0x334] sm:$0xf]  ;;  %v3060_v21 = vld [vmem:[%s3519_s7 + $0x338] sm:$0xf0] }
 0x12f   : > { %v1616_v25 = vpop.f32.mrf.mxu1  ;;  %v1440_v31 = vpop.f32.mrf.mxu2 }
 0x130   : > { %v2160_v28 = vmax.f32 %v2034_v2, 0.0  ;;  %v2347_v34 = vpack.c.bf16 %v2221_v27, %v2221_v27  ;;  %v1765_v35 = vadd.f32 %v3815_v49, %v1440_v31  ;;  %v3063_v27 = vor.u32 %v3356_v26, %v3060_v21 }
 0x131   : > { %v1287_v38 = vpop.f32.mrf.mxu0  ;;  %v2807_v31 = vor.u32 %v3292_v20, %v2804_v15  ;;  %v3050_v20 = vld [vmem:[%s3519_s7 + $0x320] sm:$0xf] }
 0x132   : > { %v2286_v39 = vpack.c.bf16 %v2160_v28, %v2160_v28  ;;  %v1612_v40 = vadd.f32 %v1611_v43, %v1287_v38  ;;  %2474 = vst.msk [vmem:[%s3651_s29 + $0x134] sm:$0xf] %vm2396_vm3, %v2347_v34  ;;  %v1966_v45 = vmul.f32 %v3631_v0, %v1765_v35  ;;  %v2794_v34 = vld [vmem:[%s3519_s7 + $0x120] sm:$0xf]  ;;  %v3291_v35 = vld [vmem:[%s3519_s7 + $0x124] sm:$0xf0] }
 0x133   : > { %v2795_v37 = vor.u32 %v3291_v35, %v2794_v34 }
 0x134   : > { %2413 = vst.msk [vmem:[%s3651_s29 + $0x40] sm:$0xf] %vm2396_vm3, %v2286_v39  ;;  %v1905_v47 = vmul.f32 %v3631_v0, %v1612_v40  ;;  %v2096_v49 = vadd.f32 %v3639_v6, %v1966_v45  ;;  %v3353_v39 = vld [vmem:[%s3519_s7 + $0x314] sm:$0xf0] }
 0x135   : > { %v3923_v13 = vpop.f32.mrf.mxu3 }
 0x136   : > { %v2035_v43 = vadd.f32 %v3639_v6, %v1905_v47  ;;  %v2222_v56 = vmax.f32 %v2096_v49, 0.0 }
 0x137   : > { %v1619_v62 = vpop.f32.mrf.mxu1  ;;  %v1442_v58 = vpop.f32.mrf.mxu2 }
 0x138   : > { %v2161_v50 = vmax.f32 %v2035_v43, 0.0  ;;  %v2348_v61 = vpack.c.bf16 %v2222_v56, %v2222_v56  ;;  %v1767_v63 = vadd.f32 %v3827_v3, %v1442_v58 }
 0x139   : > { %v1290_v4 = vpop.f32.mrf.mxu0 }
 0x13a   : > { %3206 = vmatmul.msk.bf16.gmra.mxu1 %vm1039_vm2, %v2799_v48  ;;  %v2287_v5 = vpack.c.bf16 %v2161_v50, %v2161_v50  ;;  %v1615_v7 = vadd.f32 %v1614_v32, %v1290_v4  ;;  %2475 = vst.msk [vmem:[%s3651_s29 + $0x138] sm:$0xf] %vm2396_vm3, %v2348_v61  ;;  %v1967_v57 = vmul.f32 %v3631_v0, %v1767_v63 }
 0x13b   : > { %3239 = vmatmul.msk.bf16.gmra.mxu3 %vm1039_vm2, %v3063_v27  ;;  %v3043_v48 = vor.u32 %v3353_v39, %v3042_v36 }
 0x13c   : > { %2414 = vst.msk [vmem:[%s3651_s29 + $0x44] sm:$0xf] %vm2396_vm3, %v2287_v5  ;;  %v1906_v9 = vmul.f32 %v3631_v0, %v1615_v7  ;;  %1329 = vmatmul.bf16.gmra.mxu0 %v2787_v54  ;;  %v2097_v3 = vadd.f32 %v3639_v6, %v1967_v57  ;;  %1484 = vmatmul.bf16.gmra.mxu2 %v3035_v1  ;;  %v3294_v1 = vld [vmem:[%s3519_s7 + $0x144] sm:$0xf]  ;;  %v2812_v57 = vld [vmem:[%s3519_s7 + $0x148] sm:$0xf0] }
 0x13d   : > { %v3943_v45 = vpop.f32.mrf.mxu3 }
 0x13e   : > { %v2036_v10 = vadd.f32 %v3639_v6, %v1906_v9  ;;  %v2223_v14 = vmax.f32 %v2097_v3, 0.0  ;;  %v3358_v9 = vld [vmem:[%s3519_s7 + $0x344] sm:$0xf]  ;;  %v3068_v3 = vld [vmem:[%s3519_s7 + $0x348] sm:$0xf0] }
 0x13f   : > { %v1621_v32 = vpop.f32.mrf.mxu1  ;;  %v1445_v16 = vpop.f32.mrf.mxu2 }
 0x140   : > { %v2162_v8 = vmax.f32 %v2036_v10, 0.0  ;;  %v2349_v18 = vpack.c.bf16 %v2223_v14, %v2223_v14  ;;  %v1770_v19 = vadd.f32 %v3847_v33, %v1445_v16  ;;  %v3071_v14 = vor.u32 %v3358_v9, %v3068_v3 }
 0x141   : > { %v1292_v22 = vpop.f32.mrf.mxu0  ;;  %v2815_v16 = vor.u32 %v3294_v1, %v2812_v57  ;;  %v3058_v1 = vld [vmem:[%s3519_s7 + $0x330] sm:$0xf] }
 0x142   : > { %v2288_v23 = vpack.c.bf16 %v2162_v8, %v2162_v8  ;;  %v1617_v24 = vadd.f32 %v1616_v25, %v1292_v22  ;;  %2476 = vst.msk [vmem:[%s3651_s29 + $0x13c] sm:$0xf] %vm2396_vm3, %v2349_v18  ;;  %v1968_v2 = vmul.f32 %v3631_v0, %v1770_v19  ;;  %v2802_v18 = vld [vmem:[%s3519_s7 + $0x130] sm:$0xf]  ;;  %v3293_v19 = vld [vmem:[%s3519_s7 + $0x134] sm:$0xf0] }
 0x143   : > { %v2803_v21 = vor.u32 %v3293_v19, %v2802_v18 }
 0x144   : > { %2415 = vst.msk [vmem:[%s3651_s29 + $0x48] sm:$0xf] %vm2396_vm3, %v2288_v23  ;;  %v1907_v28 = vmul.f32 %v3631_v0, %v1617_v24  ;;  %v2098_v33 = vadd.f32 %v3639_v6, %v1968_v2  ;;  %v3355_v23 = vld [vmem:[%s3519_s7 + $0x324] sm:$0xf0] }
 0x145   : > { %v3955_v54 = vpop.f32.mrf.mxu3 }
 0x146   : > { %v2037_v25 = vadd.f32 %v3639_v6, %v1907_v28  ;;  %v2224_v40 = vmax.f32 %v2098_v33, 0.0 }
 0x147   : > { %v1624_v38 = vpop.f32.mrf.mxu1  ;;  %v1447_v44 = vpop.f32.mrf.mxu2 }
 0x148   : > { %v2163_v29 = vmax.f32 %v2037_v25, 0.0  ;;  %v2350_v46 = vpack.c.bf16 %v2224_v40, %v2224_v40  ;;  %v1772_v47 = vadd.f32 %v3859_v12, %v1447_v44 }
 0x149   : > { %v1295_v49 = vpop.f32.mrf.mxu0 }
 0x14a   : > { %3207 = vmatmul.msk.bf16.gmra.mxu1 %vm1039_vm2, %v2807_v31  ;;  %v2289_v51 = vpack.c.bf16 %v2163_v29, %v2163_v29  ;;  %v1620_v52 = vadd.f32 %v1619_v62, %v1295_v49  ;;  %2477 = vst.msk [vmem:[%s3651_s29 + $0x140] sm:$0xf] %vm2396_vm3, %v2350_v46  ;;  %v1969_v43 = vmul.f32 %v3631_v0, %v1772_v47  ;;  %v3296_v49 = vld [vmem:[%s3519_s7 + $0x154] sm:$0xf] }
 0x14b   : > { %3240 = vmatmul.msk.bf16.gmra.mxu3 %vm1039_vm2, %v3071_v14  ;;  %v3051_v31 = vor.u32 %v3355_v23, %v3050_v20 }
 0x14c   : > { %2416 = vst.msk [vmem:[%s3651_s29 + $0x4c] sm:$0xf] %vm2396_vm3, %v2289_v51  ;;  %v1908_v53 = vmul.f32 %v3631_v0, %v1620_v52  ;;  %1334 = vmatmul.bf16.gmra.mxu0 %v2795_v37  ;;  %v2099_v12 = vadd.f32 %v3639_v6, %v1969_v43  ;;  %1489 = vmatmul.bf16.gmra.mxu2 %v3043_v48  ;;  %v2820_v52 = vld [vmem:[%s3519_s7 + $0x158] sm:$0xf0]  ;;  %v3360_v43 = vld [vmem:[%s3519_s7 + $0x354] sm:$0xf] }
 0x14d   : > { %v3977_v2 = vpop.f32.mrf.mxu3 }
 0x14e   : > { %v2038_v55 = vadd.f32 %v3639_v6, %v1908_v53  ;;  %v2225_v56 = vmax.f32 %v2099_v12, 0.0  ;;  %v4001_v53 = vld [vmem:[%s4552_s2] ss:$0 sm:$0xff] }
 0x14f   : > { %v1626_v62 = vpop.f32.mrf.mxu1  ;;  %v1450_v58 = vpop.f32.mrf.mxu2 }
 0x150   : > { %v2164_v50 = vmax.f32 %v2038_v55, 0.0  ;;  %v2351_v61 = vpack.c.bf16 %v2225_v56, %v2225_v56  ;;  %v1775_v63 = vadd.f32 %v3879_v17, %v1450_v58  ;;  %v2810_v58 = vld [vmem:[%s3519_s7 + $0x140] sm:$0xf] }
 0x151   : > { %v1297_v4 = vpop.f32.mrf.mxu0 }
 0x152   : > { %v2290_v5 = vpack.c.bf16 %v2164_v50, %v2164_v50  ;;  %v1622_v7 = vadd.f32 %v1621_v32, %v1297_v4  ;;  %2478 = vst.msk [vmem:[%s3651_s29 + $0x144] sm:$0xf] %vm2396_vm3, %v2351_v61  ;;  %v1970_v10 = vmul.f32 %v3631_v0, %v1775_v63  ;;  %v2823_v50 = vor.u32 %v3296_v49, %v2820_v52  ;;  %v3295_v61 = vld [vmem:[%s3519_s7 + $0x144] sm:$0xf0]  ;;  %v3066_v49 = vld [vmem:[%s3519_s7 + $0x340] sm:$0xf] }
 0x153   : > { %v2811_v3 = vor.u32 %v3295_v61, %v2810_v58 }
 0x154   : > { %2417 = vst.msk [vmem:[%s3651_s29 + $0x50] sm:$0xf] %vm2396_vm3, %v2290_v5  ;;  %v1909_v8 = vmul.f32 %v3631_v0, %v1622_v7  ;;  %v2100_v17 = vadd.f32 %v3639_v6, %v1970_v10  ;;  %v3357_v5 = vld [vmem:[%s3519_s7 + $0x334] sm:$0xf0] }
 0x155   : > { %v3989_v37 = vpop.f32.mrf.mxu3 }
 0x156   : > { %v2039_v32 = vadd.f32 %v3639_v6, %v1909_v8  ;;  %v2226_v24 = vmax.f32 %v2100_v17, 0.0 }
 0x157   : > { %v3973_v22 = vpop.f32.mrf.mxu1  ;;  %v1452_v26 = vpop.f32.mrf.mxu2 }
 0x158   : > { %v2165_v15 = vmax.f32 %v2039_v32, 0.0  ;;  %v2352_v27 = vpack.c.bf16 %v2226_v24, %v2226_v24  ;;  %v1777_v28 = vadd.f32 %v3891_v42, %v1452_v26 }
 0x159   : > { %v1300_v33 = vpop.f32.mrf.mxu0 }
 0x15a   : > { %3208 = vmatmul.msk.bf16.gmra.mxu1 %vm1039_vm2, %v2815_v16  ;;  %v2291_v34 = vpack.c.bf16 %v2165_v15, %v2165_v15  ;;  %v1625_v35 = vadd.f32 %v1624_v38, %v1300_v33  ;;  %2479 = vst.msk [vmem:[%s3651_s29 + $0x148] sm:$0xf] %vm2396_vm3, %v2352_v27  ;;  %v1971_v25 = vmul.f32 %v3631_v0, %v1777_v28 }
 0x15b   : > { %v3059_v16 = vor.u32 %v3357_v5, %v3058_v1 }
 0x15c   : > { %2418 = vst.msk [vmem:[%s3651_s29 + $0x54] sm:$0xf] %vm2396_vm3, %v2291_v34  ;;  %v1910_v36 = vmul.f32 %v3631_v0, %v1625_v35  ;;  %1339 = vmatmul.bf16.gmra.mxu0 %v2803_v21  ;;  %v2101_v42 = vadd.f32 %v3639_v6, %v1971_v25  ;;  %1494 = vmatmul.bf16.gmra.mxu2 %v3051_v31  ;;  %v3298_v31 = vld [vmem:[%s3519_s7 + $0x164] sm:$0xf]  ;;  %v2828_v25 = vld [vmem:[%s3519_s7 + $0x168] sm:$0xf0] }
 0x15e   : > { %v2040_v39 = vadd.f32 %v3639_v6, %v1910_v36  ;;  %v2227_v40 = vmax.f32 %v2101_v42, 0.0  ;;  %v3076_v6 = vld [vmem:[%s3519_s7 + $0x358] sm:$0xf0]  ;;  %v4019_v10 = vpop.f32.mrf.mxu3  ;;  %v3362_v36 = vld [vmem:[%s3519_s7 + $0x364] sm:$0xf] }
 0x15f   : > { %v1631_v38 = vpop.f32.mrf.mxu1  ;;  %v1455_v44 = vpop.f32.mrf.mxu2  ;;  %v3079_v12 = vor.u32 %v3360_v43, %v3076_v6  ;;  %v3084_v42 = vld [vmem:[%s3519_s7 + $0x368] sm:$0xf0] }
 0x160   : > { %v2166_v29 = vmax.f32 %v2040_v39, 0.0  ;;  %v2353_v46 = vpack.c.bf16 %v2227_v40, %v2227_v40  ;;  %v1780_v0 = vadd.f32 %v3911_v59, %v1455_v44  ;;  %v3087_v40 = vor.u32 %v3362_v36, %v3084_v42 }
 0x161   : > { %v1302_v47 = vpop.f32.mrf.mxu0  ;;  %3241 = vmatmul.msk.bf16.gmra.mxu3 %vm1039_vm2, %v3079_v12  ;;  %v2831_v44 = vor.u32 %v3298_v31, %v2828_v25  ;;  %v3074_v31 = vld [vmem:[%s3519_s7 + $0x350] sm:$0xf] }
 0x162   : > { %v2292_v48 = vpack.c.bf16 %v2166_v29, %v2166_v29  ;;  %v1627_v51 = vadd.f32 %v1626_v62, %v1302_v47  ;;  %2480 = vst.msk [vmem:[%s3651_s29 + $0x14c] sm:$0xf] %vm2396_vm3, %v2353_v46  ;;  %v1972_v59 = vmul.f32 %v4001_v53, %v1780_v0  ;;  %v4010_v62 = vld [vmem:[%s4553_s3] ss:$0 sm:$0xff]  ;;  %v2818_v46 = vld [vmem:[%s3519_s7 + $0x150] sm:$0xf] }
 0x163   : > { %v3297_v0 = vld [vmem:[%s3519_s7 + $0x154] sm:$0xf0] }
 0x164   : > { %2419 = vst.msk [vmem:[%s3651_s29 + $0x58] sm:$0xf] %vm2396_vm3, %v2292_v48  ;;  %v1911_v55 = vmul.f32 %v4001_v53, %v1627_v51  ;;  %v2102_v56 = vadd.f32 %v4010_v62, %v1972_v59  ;;  %v3359_v48 = vld [vmem:[%s3519_s7 + $0x344] sm:$0xf0]  ;;  %v2819_v6 = vor.u32 %v3297_v0, %v2818_v46 }
 0x166   : > { %v2041_v63 = vadd.f32 %v4010_v62, %v1911_v55  ;;  %v2228_v7 = vmax.f32 %v2102_v56, 0.0  ;;  %v4032_v21 = vpop.f32.mrf.mxu3 }
 0x167   : > { %v1634_v4 = vpop.f32.mrf.mxu1  ;;  %v1457_v9 = vpop.f32.mrf.mxu2 }
 0x168   : > { %v2167_v57 = vmax.f32 %v2041_v63, 0.0  ;;  %v2354_v14 = vpack.c.bf16 %v2228_v7, %v2228_v7  ;;  %v1782_v8 = vadd.f32 %v3923_v13, %v1457_v9 }
 0x169   : > { %v1305_v17 = vpop.f32.mrf.mxu0 }
 0x16a   : > { %3209 = vmatmul.msk.bf16.gmra.mxu1 %vm1039_vm2, %v2823_v50  ;;  %v2293_v18 = vpack.c.bf16 %v2167_v57, %v2167_v57  ;;  %v1630_v19 = vadd.f32 %v3973_v22, %v1305_v17  ;;  %2481 = vst.msk [vmem:[%s3651_s29 + $0x150] sm:$0xf] %vm2396_vm3, %v2354_v14  ;;  %v1973_v32 = vmul.f32 %v4001_v53, %v1782_v8 }
 0x16b   : > { %v3067_v50 = vor.u32 %v3359_v48, %v3066_v49 }
 0x16c   : > { %2420 = vst.msk [vmem:[%s3651_s29 + $0x5c] sm:$0xf] %vm2396_vm3, %v2293_v18  ;;  %v1912_v20 = vmul.f32 %v4001_v53, %v1630_v19  ;;  %1344 = vmatmul.bf16.gmra.mxu0 %v2811_v3  ;;  %v2103_v13 = vadd.f32 %v4010_v62, %v1973_v32  ;;  %1499 = vmatmul.bf16.gmra.mxu2 %v3059_v16  ;;  %v3300_v16 = vld [vmem:[%s3519_s7 + $0x174] sm:$0xf]  ;;  %v2836_v32 = vld [vmem:[%s3519_s7 + $0x178] sm:$0xf0] }
 0x16e   : > { %v2042_v23 = vadd.f32 %v4010_v62, %v1912_v20  ;;  %v2229_v24 = vmax.f32 %v2103_v13, 0.0  ;;  %v4052_v59 = vpop.f32.mrf.mxu3  ;;  %v3364_v20 = vld [vmem:[%s3519_s7 + $0x374] sm:$0xf]  ;;  %v3092_v13 = vld [vmem:[%s3519_s7 + $0x378] sm:$0xf0] }
 0x16f   : > { %v1636_v22 = vpop.f32.mrf.mxu1  ;;  %v1460_v26 = vpop.f32.mrf.mxu2 }
 0x170   : > { %v2168_v15 = vmax.f32 %v2042_v23, 0.0  ;;  %v2355_v27 = vpack.c.bf16 %v2229_v24, %v2229_v24  ;;  %v1785_v28 = vadd.f32 %v3943_v45, %v1460_v26  ;;  %v3095_v24 = vor.u32 %v3364_v20, %v3092_v13 }
 0x171   : > { %v1307_v33 = vpop.f32.mrf.mxu0  ;;  %3242 = vmatmul.msk.bf16.gmra.mxu3 %vm1039_vm2, %v3087_v40  ;;  %v2839_v26 = vor.u32 %v3300_v16, %v2836_v32  ;;  %v3082_v16 = vld [vmem:[%s3519_s7 + $0x360] sm:$0xf] }
 0x172   : > { %v2294_v34 = vpack.c.bf16 %v2168_v15, %v2168_v15  ;;  %v1632_v35 = vadd.f32 %v1631_v38, %v1307_v33  ;;  %2482 = vst.msk [vmem:[%s3651_s29 + $0x154] sm:$0xf] %vm2396_vm3, %v2355_v27  ;;  %v1974_v39 = vmul.f32 %v4001_v53, %v1785_v28  ;;  %v2826_v27 = vld [vmem:[%s3519_s7 + $0x160] sm:$0xf]  ;;  %v3299_v28 = vld [vmem:[%s3519_s7 + $0x164] sm:$0xf0] }
 0x173   : > { %v2827_v42 = vor.u32 %v3299_v28, %v2826_v27 }
 0x174   : > { %2421 = vst.msk [vmem:[%s3651_s29 + $0x60] sm:$0xf] %vm2396_vm3, %v2294_v34  ;;  %v1913_v29 = vmul.f32 %v4001_v53, %v1632_v35  ;;  %v2104_v45 = vadd.f32 %v4010_v62, %v1974_v39  ;;  %v3361_v34 = vld [vmem:[%s3519_s7 + $0x354] sm:$0xf0] }
 0x176   : > { %v2043_v38 = vadd.f32 %v4010_v62, %v1913_v29  ;;  %v2230_v51 = vmax.f32 %v2104_v45, 0.0  ;;  %v4064_v3 = vpop.f32.mrf.mxu3 }
 0x177   : > { %v1639_v47 = vpop.f32.mrf.mxu1  ;;  %v1462_v43 = vpop.f32.mrf.mxu2 }
 0x178   : > { %v2169_v52 = vmax.f32 %v2043_v38, 0.0  ;;  %v2356_v12 = vpack.c.bf16 %v2230_v51, %v2230_v51  ;;  %v1787_v55 = vadd.f32 %v3955_v54, %v1462_v43 }
 0x179   : > { %v1310_v56 = vpop.f32.mrf.mxu0 }
 0x17a   : > { %3210 = vmatmul.msk.bf16.gmra.mxu1 %vm1039_vm2, %v2831_v44  ;;  %v2295_v58 = vpack.c.bf16 %v2169_v52, %v2169_v52  ;;  %v1635_v61 = vadd.f32 %v1634_v4, %v1310_v56  ;;  %2483 = vst.msk [vmem:[%s3651_s29 + $0x158] sm:$0xf] %vm2396_vm3, %v2356_v12  ;;  %v1975_v63 = vmul.f32 %v4001_v53, %v1787_v55 }
 0x17b   : > { %v3075_v44 = vor.u32 %v3361_v34, %v3074_v31 }
 0x17c   : > { %2422 = vst.msk [vmem:[%s3651_s29 + $0x64] sm:$0xf] %vm2396_vm3, %v2295_v58  ;;  %v1914_v1 = vmul.f32 %v4001_v53, %v1635_v61  ;;  %1349 = vmatmul.bf16.gmra.mxu0 %v2819_v6  ;;  %v2105_v54 = vadd.f32 %v4010_v62, %v1975_v63  ;;  %1504 = vmatmul.bf16.gmra.mxu2 %v3067_v50  ;;  %v3302_v50 = vld [vmem:[%s3519_s7 + $0x184] sm:$0xf]  ;;  %v2844_v63 = vld [vmem:[%s3519_s7 + $0x188] sm:$0xf0] }
 0x17e   : > { %v2044_v5 = vadd.f32 %v4010_v62, %v1914_v1  ;;  %v2231_v7 = vmax.f32 %v2105_v54, 0.0  ;;  %v4084_v39 = vpop.f32.mrf.mxu3  ;;  %v3366_v1 = vld [vmem:[%s3519_s7 + $0x384] sm:$0xf]  ;;  %v3100_v54 = vld [vmem:[%s3519_s7 + $0x388] sm:$0xf0] }
 0x17f   : > { %v1641_v4 = vpop.f32.mrf.mxu1  ;;  %v1465_v9 = vpop.f32.mrf.mxu2 }
 0x180   : > { %v2170_v57 = vmax.f32 %v2044_v5, 0.0  ;;  %v2357_v14 = vpack.c.bf16 %v2231_v7, %v2231_v7  ;;  %v1790_v8 = vadd.f32 %v3977_v2, %v1465_v9  ;;  %v3103_v7 = vor.u32 %v3366_v1, %v3100_v54 }
 0x181   : > { %v1312_v17 = vpop.f32.mrf.mxu0  ;;  %3243 = vmatmul.msk.bf16.gmra.mxu3 %vm1039_vm2, %v3095_v24  ;;  %v2847_v9 = vor.u32 %v3302_v50, %v2844_v63  ;;  %v3090_v50 = vld [vmem:[%s3519_s7 + $0x370] sm:$0xf] }
 0x182   : > { %v2296_v18 = vpack.c.bf16 %v2170_v57, %v2170_v57  ;;  %v1637_v19 = vadd.f32 %v1636_v22, %v1312_v17  ;;  %2484 = vst.msk [vmem:[%s3651_s29 + $0x15c] sm:$0xf] %vm2396_vm3, %v2357_v14  ;;  %v1976_v23 = vmul.f32 %v4001_v53, %v1790_v8  ;;  %v2834_v14 = vld [vmem:[%s3519_s7 + $0x170] sm:$0xf]  ;;  %v3301_v8 = vld [vmem:[%s3519_s7 + $0x174] sm:$0xf0] }
 0x183   : > { %v2835_v13 = vor.u32 %v3301_v8, %v2834_v14 }
 0x184   : > { %2423 = vst.msk [vmem:[%s3651_s29 + $0x68] sm:$0xf] %vm2396_vm3, %v2296_v18  ;;  %v1915_v15 = vmul.f32 %v4001_v53, %v1637_v19  ;;  %v2106_v2 = vadd.f32 %v4010_v62, %v1976_v23  ;;  %v3363_v18 = vld [vmem:[%s3519_s7 + $0x364] sm:$0xf0] }
 0x186   : > { %v2045_v22 = vadd.f32 %v4010_v62, %v1915_v15  ;;  %v2232_v35 = vmax.f32 %v2106_v2, 0.0  ;;  %v4096_v6 = vpop.f32.mrf.mxu3 }
 0x187   : > { %v1644_v33 = vpop.f32.mrf.mxu1  ;;  %v1467_v36 = vpop.f32.mrf.mxu2 }
 0x188   : > { %v2171_v25 = vmax.f32 %v2045_v22, 0.0  ;;  %v2358_v40 = vpack.c.bf16 %v2232_v35, %v2232_v35  ;;  %v1792_v29 = vadd.f32 %v3989_v37, %v1467_v36 }
 0x189   : > { %v1315_v45 = vpop.f32.mrf.mxu0 }
 0x18a   : > { %3211 = vmatmul.msk.bf16.gmra.mxu1 %vm1039_vm2, %v2839_v26  ;;  %v2297_v46 = vpack.c.bf16 %v2171_v25, %v2171_v25  ;;  %v1640_v0 = vadd.f32 %v1639_v47, %v1315_v45  ;;  %2485 = vst.msk [vmem:[%s3651_s29 + $0x160] sm:$0xf] %vm2396_vm3, %v2358_v40  ;;  %v1977_v38 = vmul.f32 %v4001_v53, %v1792_v29 }
 0x18b   : > { %v3083_v26 = vor.u32 %v3363_v18, %v3082_v16 }
 0x18c   : > { %2424 = vst.msk [vmem:[%s3651_s29 + $0x6c] sm:$0xf] %vm2396_vm3, %v2297_v46  ;;  %v1916_v49 = vmul.f32 %v4001_v53, %v1640_v0  ;;  %1354 = vmatmul.bf16.gmra.mxu0 %v2827_v42  ;;  %v2107_v37 = vadd.f32 %v4010_v62, %v1977_v38  ;;  %1509 = vmatmul.bf16.gmra.mxu2 %v3075_v44  ;;  %v3304_v44 = vld [vmem:[%s3519_s7 + $0x194] sm:$0xf]  ;;  %v2852_v38 = vld [vmem:[%s3519_s7 + $0x198] sm:$0xf0] }
 0x18e   : > { %v2046_v48 = vadd.f32 %v4010_v62, %v1916_v49  ;;  %v2233_v51 = vmax.f32 %v2107_v37, 0.0  ;;  %v4116_v23 = vpop.f32.mrf.mxu3  ;;  %v3368_v49 = vld [vmem:[%s3519_s7 + $0x394] sm:$0xf]  ;;  %v3108_v37 = vld [vmem:[%s3519_s7 + $0x398] sm:$0xf0] }
 0x18f   : > { %v1646_v47 = vpop.f32.mrf.mxu1  ;;  %v1470_v43 = vpop.f32.mrf.mxu2 }
 0x190   : > { %v2172_v52 = vmax.f32 %v2046_v48, 0.0  ;;  %v2359_v12 = vpack.c.bf16 %v2233_v51, %v2233_v51  ;;  %v1795_v55 = vadd.f32 %v4019_v10, %v1470_v43  ;;  %v3111_v51 = vor.u32 %v3368_v49, %v3108_v37 }
 0x191   : > { %v1317_v56 = vpop.f32.mrf.mxu0  ;;  %3244 = vmatmul.msk.bf16.gmra.mxu3 %vm1039_vm2, %v3103_v7  ;;  %v2855_v43 = vor.u32 %v3304_v44, %v2852_v38  ;;  %v3098_v44 = vld [vmem:[%s3519_s7 + $0x380] sm:$0xf] }
 0x192   : > { %v2298_v58 = vpack.c.bf16 %v2172_v52, %v2172_v52  ;;  %v1642_v61 = vadd.f32 %v1641_v4, %v1317_v56  ;;  %2486 = vst.msk [vmem:[%s3651_s29 + $0x164] sm:$0xf] %vm2396_vm3, %v2359_v12  ;;  %v1978_v5 = vmul.f32 %v4001_v53, %v1795_v55  ;;  %v2842_v12 = vld [vmem:[%s3519_s7 + $0x180] sm:$0xf]  ;;  %v3303_v55 = vld [vmem:[%s3519_s7 + $0x184] sm:$0xf0] }
 0x193   : > { %v2843_v54 = vor.u32 %v3303_v55, %v2842_v12 }
 0x194   : > { %2425 = vst.msk [vmem:[%s3651_s29 + $0x70] sm:$0xf] %vm2396_vm3, %v2298_v58  ;;  %v1917_v57 = vmul.f32 %v4001_v53, %v1642_v61  ;;  %v2108_v10 = vadd.f32 %v4010_v62, %v1978_v5  ;;  %v3365_v58 = vld [vmem:[%s3519_s7 + $0x374] sm:$0xf0] }
 0x196   : > { %v2047_v4 = vadd.f32 %v4010_v62, %v1917_v57  ;;  %v2234_v19 = vmax.f32 %v2108_v10, 0.0  ;;  %v4128_v42 = vpop.f32.mrf.mxu3 }
 0x197   : > { %v1649_v17 = vpop.f32.mrf.mxu1  ;;  %v1472_v20 = vpop.f32.mrf.mxu2 }
 0x198   : > { %v2173_v32 = vmax.f32 %v2047_v4, 0.0  ;;  %v2360_v24 = vpack.c.bf16 %v2234_v19, %v2234_v19  ;;  %v1797_v15 = vadd.f32 %v4032_v21, %v1472_v20 }
 0x199   : > { %v1320_v2 = vpop.f32.mrf.mxu0 }
 0x19a   : > { %3212 = vmatmul.msk.bf16.gmra.mxu1 %vm1039_vm2, %v2847_v9  ;;  %v2299_v27 = vpack.c.bf16 %v2173_v32, %v2173_v32  ;;  %v1645_v28 = vadd.f32 %v1644_v33, %v1320_v2  ;;  %2487 = vst.msk [vmem:[%s3651_s29 + $0x168] sm:$0xf] %vm2396_vm3, %v2360_v24  ;;  %v1979_v22 = vmul.f32 %v4001_v53, %v1797_v15 }
 0x19b   : > { %v3091_v9 = vor.u32 %v3365_v58, %v3090_v50 }
 0x19c   : > { %2426 = vst.msk [vmem:[%s3651_s29 + $0x74] sm:$0xf] %vm2396_vm3, %v2299_v27  ;;  %v1918_v31 = vmul.f32 %v4001_v53, %v1645_v28  ;;  %1359 = vmatmul.bf16.gmra.mxu0 %v2835_v13  ;;  %v2109_v21 = vadd.f32 %v4010_v62, %v1979_v22  ;;  %1514 = vmatmul.bf16.gmra.mxu2 %v3083_v26  ;;  %v3306_v26 = vld [vmem:[%s3519_s7 + $0x1a4] sm:$0xf]  ;;  %v2860_v22 = vld [vmem:[%s3519_s7 + $0x1a8] sm:$0xf0] }
 0x19e   : > { %v2048_v34 = vadd.f32 %v4010_v62, %v1918_v31  ;;  %v2235_v35 = vmax.f32 %v2109_v21, 0.0  ;;  %v4148_v5 = vpop.f32.mrf.mxu3  ;;  %v3370_v31 = vld [vmem:[%s3519_s7 + $0x3a4] sm:$0xf]  ;;  %v3116_v21 = vld [vmem:[%s3519_s7 + $0x3a8] sm:$0xf0] }
 0x19f   : > { %v1651_v33 = vpop.f32.mrf.mxu1  ;;  %v1475_v36 = vpop.f32.mrf.mxu2 }
 0x1a0   : > { %v2174_v25 = vmax.f32 %v2048_v34, 0.0  ;;  %v2361_v40 = vpack.c.bf16 %v2235_v35, %v2235_v35  ;;  %v1800_v29 = vadd.f32 %v4052_v59, %v1475_v36  ;;  %v3119_v35 = vor.u32 %v3370_v31, %v3116_v21 }
 0x1a1   : > { %v1322_v45 = vpop.f32.mrf.mxu0  ;;  %3245 = vmatmul.msk.bf16.gmra.mxu3 %vm1039_vm2, %v3111_v51  ;;  %v2863_v36 = vor.u32 %v3306_v26, %v2860_v22  ;;  %v3106_v26 = vld [vmem:[%s3519_s7 + $0x390] sm:$0xf] }
 0x1a2   : > { %v2300_v46 = vpack.c.bf16 %v2174_v25, %v2174_v25  ;;  %v1647_v0 = vadd.f32 %v1646_v47, %v1322_v45  ;;  %2488 = vst.msk [vmem:[%s3651_s29 + $0x16c] sm:$0xf] %vm2396_vm3, %v2361_v40  ;;  %v1980_v48 = vmul.f32 %v4001_v53, %v1800_v29  ;;  %v2850_v40 = vld [vmem:[%s3519_s7 + $0x190] sm:$0xf]  ;;  %v3305_v29 = vld [vmem:[%s3519_s7 + $0x194] sm:$0xf0] }
 0x1a3   : > { %v2851_v37 = vor.u32 %v3305_v29, %v2850_v40 }
 0x1a4   : > { %2427 = vst.msk [vmem:[%s3651_s29 + $0x78] sm:$0xf] %vm2396_vm3, %v2300_v46  ;;  %v1919_v52 = vmul.f32 %v4001_v53, %v1647_v0  ;;  %v2110_v59 = vadd.f32 %v4010_v62, %v1980_v48  ;;  %v3367_v46 = vld [vmem:[%s3519_s7 + $0x384] sm:$0xf0] }
 0x1a6   : > { %v2049_v47 = vadd.f32 %v4010_v62, %v1919_v52  ;;  %v2236_v61 = vmax.f32 %v2110_v59, 0.0  ;;  %v4160_v13 = vpop.f32.mrf.mxu3 }
 0x1a7   : > { %v1654_v56 = vpop.f32.mrf.mxu1  ;;  %v1477_v1 = vpop.f32.mrf.mxu2 }
 0x1a8   : > { %v2175_v63 = vmax.f32 %v2049_v47, 0.0  ;;  %v2362_v7 = vpack.c.bf16 %v2236_v61, %v2236_v61  ;;  %v1802_v57 = vadd.f32 %v4064_v3, %v1477_v1 }
 0x1a9   : > { %v1325_v10 = vpop.f32.mrf.mxu0 }
 0x1aa   : > { %3213 = vmatmul.msk.bf16.gmra.mxu1 %vm1039_vm2, %v2855_v43  ;;  %v2301_v14 = vpack.c.bf16 %v2175_v63, %v2175_v63  ;;  %v1650_v8 = vadd.f32 %v1649_v17, %v1325_v10  ;;  %2489 = vst.msk [vmem:[%s3651_s29 + $0x170] sm:$0xf] %vm2396_vm3, %v2362_v7  ;;  %v1981_v4 = vmul.f32 %v4001_v53, %v1802_v57 }
 0x1ab   : > { %v3099_v43 = vor.u32 %v3367_v46, %v3098_v44 }
 0x1ac   : > { %2428 = vst.msk [vmem:[%s3651_s29 + $0x7c] sm:$0xf] %vm2396_vm3, %v2301_v14  ;;  %v1920_v16 = vmul.f32 %v4001_v53, %v1650_v8  ;;  %1364 = vmatmul.bf16.gmra.mxu0 %v2843_v54  ;;  %v2111_v3 = vadd.f32 %v4010_v62, %v1981_v4  ;;  %1519 = vmatmul.bf16.gmra.mxu2 %v3091_v9  ;;  %v3308_v9 = vld [vmem:[%s3519_s7 + $0x1b4] sm:$0xf]  ;;  %v2868_v4 = vld [vmem:[%s3519_s7 + $0x1b8] sm:$0xf0] }
 0x1ae   : > { %v2050_v18 = vadd.f32 %v4010_v62, %v1920_v16  ;;  %v2237_v19 = vmax.f32 %v2111_v3, 0.0  ;;  %v4180_v48 = vpop.f32.mrf.mxu3  ;;  %v3372_v16 = vld [vmem:[%s3519_s7 + $0x3b4] sm:$0xf]  ;;  %v3124_v3 = vld [vmem:[%s3519_s7 + $0x3b8] sm:$0xf0] }
 0x1af   : > { %v1656_v17 = vpop.f32.mrf.mxu1  ;;  %v1480_v20 = vpop.f32.mrf.mxu2 }
 0x1b0   : > { %v2176_v32 = vmax.f32 %v2050_v18, 0.0  ;;  %v2363_v24 = vpack.c.bf16 %v2237_v19, %v2237_v19  ;;  %v1805_v15 = vadd.f32 %v4084_v39, %v1480_v20  ;;  %v3127_v19 = vor.u32 %v3372_v16, %v3124_v3 }
 0x1b1   : > { %v1327_v2 = vpop.f32.mrf.mxu0  ;;  %3246 = vmatmul.msk.bf16.gmra.mxu3 %vm1039_vm2, %v3119_v35  ;;  %v2871_v20 = vor.u32 %v3308_v9, %v2868_v4  ;;  %v3114_v9 = vld [vmem:[%s3519_s7 + $0x3a0] sm:$0xf] }
 0x1b2   : > { %v2302_v27 = vpack.c.bf16 %v2176_v32, %v2176_v32  ;;  %v1652_v28 = vadd.f32 %v1651_v33, %v1327_v2  ;;  %2490 = vst.msk [vmem:[%s3651_s29 + $0x174] sm:$0xf] %vm2396_vm3, %v2363_v24  ;;  %v1982_v34 = vmul.f32 %v4001_v53, %v1805_v15  ;;  %v2858_v24 = vld [vmem:[%s3519_s7 + $0x1a0] sm:$0xf]  ;;  %v3307_v15 = vld [vmem:[%s3519_s7 + $0x1a4] sm:$0xf0] }
 0x1b3   : > { %v2859_v21 = vor.u32 %v3307_v15, %v2858_v24 }
 0x1b4   : > { %2429 = vst.msk [vmem:[%s3651_s29 + $0x80] sm:$0xf] %vm2396_vm3, %v2302_v27  ;;  %v1921_v25 = vmul.f32 %v4001_v53, %v1652_v28  ;;  %v2112_v39 = vadd.f32 %v4010_v62, %v1982_v34  ;;  %v3369_v27 = vld [vmem:[%s3519_s7 + $0x394] sm:$0xf0] }
 0x1b6   : > { %v2051_v33 = vadd.f32 %v4010_v62, %v1921_v25  ;;  %v2238_v0 = vmax.f32 %v2112_v39, 0.0  ;;  %v4192_v54 = vpop.f32.mrf.mxu3 }
 0x1b7   : > { %v1659_v45 = vpop.f32.mrf.mxu1  ;;  %v1482_v49 = vpop.f32.mrf.mxu2 }
 0x1b8   : > { %v2177_v38 = vmax.f32 %v2051_v33, 0.0  ;;  %v2364_v51 = vpack.c.bf16 %v2238_v0, %v2238_v0  ;;  %v1807_v52 = vadd.f32 %v4096_v6, %v1482_v49 }
 0x1b9   : > { %v1330_v59 = vpop.f32.mrf.mxu0 }
 0x1ba   : > { %3214 = vmatmul.msk.bf16.gmra.mxu1 %vm1039_vm2, %v2863_v36  ;;  %v2303_v12 = vpack.c.bf16 %v2177_v38, %v2177_v38  ;;  %v1655_v55 = vadd.f32 %v1654_v56, %v1330_v59  ;;  %2491 = vst.msk [vmem:[%s3651_s29 + $0x178] sm:$0xf] %vm2396_vm3, %v2364_v51  ;;  %v1983_v47 = vmul.f32 %v4001_v53, %v1807_v52 }
 0x1bb   : > { %v3107_v36 = vor.u32 %v3369_v27, %v3106_v26 }
 0x1bc   : > { %2430 = vst.msk [vmem:[%s3651_s29 + $0x84] sm:$0xf] %vm2396_vm3, %v2303_v12  ;;  %v1922_v50 = vmul.f32 %v4001_v53, %v1655_v55  ;;  %1369 = vmatmul.bf16.gmra.mxu0 %v2851_v37  ;;  %v2113_v6 = vadd.f32 %v4010_v62, %v1983_v47  ;;  %1524 = vmatmul.bf16.gmra.mxu2 %v3099_v43  ;;  %v3310_v43 = vld [vmem:[%s3519_s7 + $0x1c4] sm:$0xf]  ;;  %v2876_v47 = vld [vmem:[%s3519_s7 + $0x1c8] sm:$0xf0] }
 0x1be   : > { %v2052_v58 = vadd.f32 %v4010_v62, %v1922_v50  ;;  %v2239_v61 = vmax.f32 %v2113_v6, 0.0  ;;  %v4212_v34 = vpop.f32.mrf.mxu3  ;;  %v3374_v50 = vld [vmem:[%s3519_s7 + $0x3c4] sm:$0xf]  ;;  %v3132_v6 = vld [vmem:[%s3519_s7 + $0x3c8] sm:$0xf0] }
 0x1bf   : > { %v1661_v56 = vpop.f32.mrf.mxu1  ;;  %v1485_v1 = vpop.f32.mrf.mxu2 }
 0x1c0   : > { %v2178_v63 = vmax.f32 %v2052_v58, 0.0  ;;  %v2365_v7 = vpack.c.bf16 %v2239_v61, %v2239_v61  ;;  %v1810_v57 = vadd.f32 %v4116_v23, %v1485_v1  ;;  %v3135_v61 = vor.u32 %v3374_v50, %v3132_v6 }
 0x1c1   : > { %v1332_v10 = vpop.f32.mrf.mxu0  ;;  %3247 = vmatmul.msk.bf16.gmra.mxu3 %vm1039_vm2, %v3127_v19  ;;  %v2879_v1 = vor.u32 %v3310_v43, %v2876_v47  ;;  %v3122_v43 = vld [vmem:[%s3519_s7 + $0x3b0] sm:$0xf] }
 0x1c2   : > { %v2304_v14 = vpack.c.bf16 %v2178_v63, %v2178_v63  ;;  %v1657_v8 = vadd.f32 %v1656_v17, %v1332_v10  ;;  %2492 = vst.msk [vmem:[%s3651_s29 + $0x17c] sm:$0xf] %vm2396_vm3, %v2365_v7  ;;  %v1984_v18 = vmul.f32 %v4001_v53, %v1810_v57  ;;  %v2866_v7 = vld [vmem:[%s3519_s7 + $0x1b0] sm:$0xf]  ;;  %v3309_v57 = vld [vmem:[%s3519_s7 + $0x1b4] sm:$0xf0] }
 0x1c3   : > { %v2867_v3 = vor.u32 %v3309_v57, %v2866_v7 }
 0x1c4   : > { %2431 = vst.msk [vmem:[%s3651_s29 + $0x88] sm:$0xf] %vm2396_vm3, %v2304_v14  ;;  %v1923_v32 = vmul.f32 %v4001_v53, %v1657_v8  ;;  %v2114_v23 = vadd.f32 %v4010_v62, %v1984_v18  ;;  %v3371_v14 = vld [vmem:[%s3519_s7 + $0x3a4] sm:$0xf0] }
 0x1c6   : > { %v2053_v17 = vadd.f32 %v4010_v62, %v1923_v32  ;;  %v2240_v28 = vmax.f32 %v2114_v23, 0.0  ;;  %v4224_v37 = vpop.f32.mrf.mxu3 }
 0x1c7   : > { %v1664_v2 = vpop.f32.mrf.mxu1  ;;  %v1487_v31 = vpop.f32.mrf.mxu2 }
 0x1c8   : > { %v2179_v22 = vmax.f32 %v2053_v17, 0.0  ;;  %v2366_v35 = vpack.c.bf16 %v2240_v28, %v2240_v28  ;;  %v1812_v25 = vadd.f32 %v4128_v42, %v1487_v31 }
 0x1c9   : > { %v1335_v39 = vpop.f32.mrf.mxu0 }
 0x1ca   : > { %3215 = vmatmul.msk.bf16.gmra.mxu1 %vm1039_vm2, %v2871_v20  ;;  %v2305_v40 = vpack.c.bf16 %v2179_v22, %v2179_v22  ;;  %v1660_v29 = vadd.f32 %v1659_v45, %v1335_v39  ;;  %2493 = vst.msk [vmem:[%s3651_s29 + $0x180] sm:$0xf] %vm2396_vm3, %v2366_v35  ;;  %v1985_v33 = vmul.f32 %v4001_v53, %v1812_v25 }
 0x1cb   : > { %v3115_v20 = vor.u32 %v3371_v14, %v3114_v9 }
 0x1cc   : > { %2432 = vst.msk [vmem:[%s3651_s29 + $0x8c] sm:$0xf] %vm2396_vm3, %v2305_v40  ;;  %v1924_v44 = vmul.f32 %v4001_v53, %v1660_v29  ;;  %1374 = vmatmul.bf16.gmra.mxu0 %v2859_v21  ;;  %v2115_v42 = vadd.f32 %v4010_v62, %v1985_v33  ;;  %1529 = vmatmul.bf16.gmra.mxu2 %v3107_v36  ;;  %v3312_v36 = vld [vmem:[%s3519_s7 + $0x1d4] sm:$0xf]  ;;  %v2884_v33 = vld [vmem:[%s3519_s7 + $0x1d8] sm:$0xf0] }
 0x1ce   : > { %v2054_v46 = vadd.f32 %v4010_v62, %v1924_v44  ;;  %v2241_v0 = vmax.f32 %v2115_v42, 0.0  ;;  %v4244_v18 = vpop.f32.mrf.mxu3  ;;  %v3376_v44 = vld [vmem:[%s3519_s7 + $0x3d4] sm:$0xf]  ;;  %v3140_v42 = vld [vmem:[%s3519_s7 + $0x3d8] sm:$0xf0] }
 0x1cf   : > { %v1666_v45 = vpop.f32.mrf.mxu1  ;;  %v1490_v49 = vpop.f32.mrf.mxu2 }
 0x1d0   : > { %v2180_v38 = vmax.f32 %v2054_v46, 0.0  ;;  %v2367_v51 = vpack.c.bf16 %v2241_v0, %v2241_v0  ;;  %v1815_v52 = vadd.f32 %v4148_v5, %v1490_v49  ;;  %v3143_v0 = vor.u32 %v3376_v44, %v3140_v42 }
 0x1d1   : > { %v1337_v59 = vpop.f32.mrf.mxu0  ;;  %3248 = vmatmul.msk.bf16.gmra.mxu3 %vm1039_vm2, %v3135_v61  ;;  %v2887_v49 = vor.u32 %v3312_v36, %v2884_v33  ;;  %v3130_v36 = vld [vmem:[%s3519_s7 + $0x3c0] sm:$0xf] }
 0x1d2   : > { %v2306_v12 = vpack.c.bf16 %v2180_v38, %v2180_v38  ;;  %v1662_v55 = vadd.f32 %v1661_v56, %v1337_v59  ;;  %2494 = vst.msk [vmem:[%s3651_s29 + $0x184] sm:$0xf] %vm2396_vm3, %v2367_v51  ;;  %v1986_v58 = vmul.f32 %v4001_v53, %v1815_v52  ;;  %v2874_v51 = vld [vmem:[%s3519_s7 + $0x1c0] sm:$0xf]  ;;  %v3311_v52 = vld [vmem:[%s3519_s7 + $0x1c4] sm:$0xf0] }
 0x1d3   : > { %v2875_v6 = vor.u32 %v3311_v52, %v2874_v51 }
 0x1d4   : > { %2433 = vst.msk [vmem:[%s3651_s29 + $0x90] sm:$0xf] %vm2396_vm3, %v2306_v12  ;;  %v1925_v63 = vmul.f32 %v4001_v53, %v1662_v55  ;;  %v2116_v5 = vadd.f32 %v4010_v62, %v1986_v58  ;;  %v3373_v12 = vld [vmem:[%s3519_s7 + $0x3b4] sm:$0xf0] }
 0x1d6   : > { %v2055_v56 = vadd.f32 %v4010_v62, %v1925_v63  ;;  %v2242_v8 = vmax.f32 %v2116_v5, 0.0  ;;  %v4256_v21 = vpop.f32.mrf.mxu3  ;;  %v3123_v5 = vor.u32 %v3373_v12, %v3122_v43 }
 0x1d7   : > { %v1669_v10 = vpop.f32.mrf.mxu1  ;;  %v1492_v16 = vpop.f32.mrf.mxu2 }
 0x1d8   : > { %v2181_v4 = vmax.f32 %v2055_v56, 0.0  ;;  %v2368_v19 = vpack.c.bf16 %v2242_v8, %v2242_v8  ;;  %v1817_v32 = vadd.f32 %v4160_v13, %v1492_v16 }
 0x1d9   : > { %v1340_v23 = vpop.f32.mrf.mxu0 }
 0x1da   : > { %3216 = vmatmul.msk.bf16.gmra.mxu1 %vm1039_vm2, %v2879_v1  ;;  %v2307_v24 = vpack.c.bf16 %v2181_v4, %v2181_v4  ;;  %v1665_v15 = vadd.f32 %v1664_v2, %v1340_v23  ;;  %2495 = vst.msk [vmem:[%s3651_s29 + $0x188] sm:$0xf] %vm2396_vm3, %v2368_v19  ;;  %v1987_v17 = vmul.f32 %v4001_v53, %v1817_v32  ;;  %v3314_v23 = vld [vmem:[%s3519_s7 + $0x1e4] sm:$0xf] }
 0x1dc   : > { %2434 = vst.msk [vmem:[%s3651_s29 + $0x94] sm:$0xf] %vm2396_vm3, %v2307_v24  ;;  %v1926_v26 = vmul.f32 %v4001_v53, %v1665_v15  ;;  %1379 = vmatmul.bf16.gmra.mxu0 %v2867_v3  ;;  %v2117_v13 = vadd.f32 %v4010_v62, %v1987_v17  ;;  %1534 = vmatmul.bf16.gmra.mxu2 %v3115_v20  ;;  %v2892_v15 = vld [vmem:[%s3519_s7 + $0x1e8] sm:$0xf0]  ;;  %v3378_v17 = vld [vmem:[%s3519_s7 + $0x3e4] sm:$0xf] }
 0x1de   : > { %v2056_v27 = vadd.f32 %v4010_v62, %v1926_v26  ;;  %v2243_v28 = vmax.f32 %v2117_v13, 0.0  ;;  %v3148_v26 = vld [vmem:[%s3519_s7 + $0x3e8] sm:$0xf0] }
 0x1df   : > { %v1671_v2 = vpop.f32.mrf.mxu1  ;;  %v1495_v31 = vpop.f32.mrf.mxu2 }
 0x1e0   : > { %v2182_v22 = vmax.f32 %v2056_v27, 0.0  ;;  %v2369_v35 = vpack.c.bf16 %v2243_v28, %v2243_v28  ;;  %v1820_v25 = vadd.f32 %v4180_v48, %v1495_v31  ;;  %v3151_v27 = vor.u32 %v3378_v17, %v3148_v26 }
 0x1e1   : > { %v1342_v39 = vpop.f32.mrf.mxu0  ;;  %3249 = vmatmul.msk.bf16.gmra.mxu3 %vm1039_vm2, %v3143_v0  ;;  %v2895_v31 = vor.u32 %v3314_v23, %v2892_v15 }
 0x1e2   : > { %v2308_v40 = vpack.c.bf16 %v2182_v22, %v2182_v22  ;;  %v1667_v29 = vadd.f32 %v1666_v45, %v1342_v39  ;;  %2496 = vst.msk [vmem:[%s3651_s29 + $0x18c] sm:$0xf] %vm2396_vm3, %v2369_v35  ;;  %v1988_v46 = vmul.f32 %v4001_v53, %v1820_v25  ;;  %v3313_v35 = vld [vmem:[%s3519_s7 + $0x1d4] sm:$0xf0] }
 0x1e4   : > { %2435 = vst.msk [vmem:[%s3651_s29 + $0x98] sm:$0xf] %vm2396_vm3, %v2308_v40  ;;  %v1927_v38 = vmul.f32 %v4001_v53, %v1667_v29  ;;  %v2118_v48 = vadd.f32 %v4010_v62, %v1988_v46  ;;  %v4278_v57 = vpop.f32.mrf.mxu3  ;;  %v3375_v40 = vld [vmem:[%s3519_s7 + $0x3c4] sm:$0xf0] }
 0x1e6   : > { %v2057_v45 = vadd.f32 %v4010_v62, %v1927_v38  ;;  %v2244_v55 = vmax.f32 %v2118_v48, 0.0  ;;  %v3131_v48 = vor.u32 %v3375_v40, %v3130_v36 }
 0x1e7   : > { %v1674_v59 = vpop.f32.mrf.mxu1  ;;  %v1497_v50 = vpop.f32.mrf.mxu2 }
 0x1e8   : > { %v2183_v47 = vmax.f32 %v2057_v45, 0.0  ;;  %v2370_v58 = vpack.c.bf16 %v2244_v55, %v2244_v55  ;;  %v1822_v61 = vadd.f32 %v4192_v54, %v1497_v50 }
 0x1e9   : > { %v1345_v63 = vpop.f32.mrf.mxu0 }
 0x1ea   : > { %3217 = vmatmul.msk.bf16.gmra.mxu1 %vm1039_vm2, %v2887_v49  ;;  %v2309_v1 = vpack.c.bf16 %v2183_v47, %v2183_v47  ;;  %v1670_v7 = vadd.f32 %v1669_v10, %v1345_v63  ;;  %2497 = vst.msk [vmem:[%s3651_s29 + $0x190] sm:$0xf] %vm2396_vm3, %v2370_v58  ;;  %v1989_v56 = vmul.f32 %v4001_v53, %v1822_v61 }
 0x1ec   : > { %2436 = vst.msk [vmem:[%s3651_s29 + $0x9c] sm:$0xf] %vm2396_vm3, %v2309_v1  ;;  %v1928_v9 = vmul.f32 %v4001_v53, %v1670_v7  ;;  %1384 = vmatmul.bf16.gmra.mxu0 %v2875_v6  ;;  %v2119_v54 = vadd.f32 %v4010_v62, %v1989_v56  ;;  %1539 = vmatmul.bf16.gmra.mxu2 %v3123_v5  ;;  %v4299_v28 = vpop.f32.mrf.mxu3  ;;  %v3316_v1 = vld [vmem:[%s3519_s7 + $0x1f4] sm:$0xf]  ;;  %v2900_v7 = vld [vmem:[%s3519_s7 + $0x1f8] sm:$0xf0] }
 0x1ee   : > { %v2058_v10 = vadd.f32 %v4010_v62, %v1928_v9  ;;  %v2245_v8 = vmax.f32 %v2119_v54, 0.0 }
 0x1ef   : > { %v1676_v14 = vpop.f32.mrf.mxu1  ;;  %v1500_v16 = vpop.f32.mrf.mxu2 }
 0x1f0   : > { %v2184_v4 = vmax.f32 %v2058_v10, 0.0  ;;  %v2371_v3 = vpack.c.bf16 %v2245_v8, %v2245_v8  ;;  %v1825_v19 = vadd.f32 %v4212_v34, %v1500_v16  ;;  %v2903_v10 = vor.u32 %v3316_v1, %v2900_v7  ;;  %v2890_v8 = vld [vmem:[%s3519_s7 + $0x1e0] sm:$0xf] }
 0x1f1   : > { %v1347_v32 = vpop.f32.mrf.mxu0  ;;  %3250 = vmatmul.msk.bf16.gmra.mxu3 %vm1039_vm2, %v3151_v27 }
 0x1f2   : > { %v2310_v20 = vpack.c.bf16 %v2184_v4, %v2184_v4  ;;  %v1672_v24 = vadd.f32 %v1671_v2, %v1347_v32  ;;  %2498 = vst.msk [vmem:[%s3651_s29 + $0x194] sm:$0xf] %vm2396_vm3, %v2371_v3  ;;  %v1990_v13 = vmul.f32 %v4001_v53, %v1825_v19  ;;  %v2882_v2 = vld [vmem:[%s3519_s7 + $0x1d0] sm:$0xf]  ;;  %v3377_v3 = vld [vmem:[%s3519_s7 + $0x3d4] sm:$0xf0] }
 0x1f3   : > { %v2883_v42 = vor.u32 %v3313_v35, %v2882_v2 }
 0x1f4   : > { %2437 = vst.msk [vmem:[%s3651_s29 + $0xa0] sm:$0xf] %vm2396_vm3, %v2310_v20  ;;  %v1929_v34 = vmul.f32 %v4001_v53, %v1672_v24  ;;  %v2120_v22 = vadd.f32 %v4010_v62, %v1990_v13 }
 0x1f6   : > { %v2059_v25 = vadd.f32 %v4010_v62, %v1929_v34  ;;  %v2246_v29 = vmax.f32 %v2120_v22, 0.0 }
 0x1f7   : > { %v1679_v39 = vpop.f32.mrf.mxu1  ;;  %v1502_v44 = vpop.f32.mrf.mxu2 }
 0x1f8   : > { %v2185_v33 = vmax.f32 %v2059_v25, 0.0  ;;  %v2372_v46 = vpack.c.bf16 %v2246_v29, %v2246_v29  ;;  %v1827_v0 = vadd.f32 %v4224_v37, %v1502_v44 }
 0x1f9   : > { %v1350_v38 = vpop.f32.mrf.mxu0 }
 0x1fa   : > { %3218 = vmatmul.msk.bf16.gmra.mxu1 %vm1039_vm2, %v2895_v31  ;;  %v2311_v49 = vpack.c.bf16 %v2185_v33, %v2185_v33  ;;  %v1675_v51 = vadd.f32 %v1674_v59, %v1350_v38  ;;  %2499 = vst.msk [vmem:[%s3651_s29 + $0x198] sm:$0xf] %vm2396_vm3, %v2372_v46  ;;  %v1991_v52 = vmul.f32 %v4001_v53, %v1827_v0  ;;  %v4318_v59 = vpop.f32.mrf.mxu3  ;;  %v2908_v46 = vld [vmem:[%s3519_s7 + $0x208] sm:$0xf0] }
 0x1fc   : > { %2438 = vst.msk [vmem:[%s3651_s29 + $0xa4] sm:$0xf] %vm2396_vm3, %v2311_v49  ;;  %v1930_v45 = vmul.f32 %v4001_v53, %v1675_v51  ;;  %1389 = vmatmul.bf16.gmra.mxu0 %v2883_v42  ;;  %v2121_v37 = vadd.f32 %v4010_v62, %v1991_v52  ;;  %1544 = vmatmul.bf16.gmra.mxu2 %v3131_v48  ;;  %v3318_v42 = vld [vmem:[%s3519_s7 + $0x204] sm:$0xf]  ;;  %v4366_v48 = vld [vmem:[%s4553_s3] ss:$0 sm:$0xff] }
 0x1fd   : > { %v2911_v51 = vor.u32 %v3318_v42, %v2908_v46 }
 0x1fe   : > { %v2060_v43 = vadd.f32 %v4010_v62, %v1930_v45  ;;  %v2247_v55 = vmax.f32 %v2121_v37, 0.0  ;;  %v3146_v37 = vld [vmem:[%s3519_s7 + $0x3e0] sm:$0xf] }
 0x1ff   : > { %v1681_v12 = vpop.f32.mrf.mxu1  ;;  %v1505_v50 = vpop.f32.mrf.mxu2 }
 0x200   : > { %v2186_v47 = vmax.f32 %v2060_v43, 0.0  ;;  %v2373_v6 = vpack.c.bf16 %v2247_v55, %v2247_v55  ;;  %v1830_v58 = vadd.f32 %v4244_v18, %v1505_v50  ;;  %v3315_v18 = vld [vmem:[%s3519_s7 + $0x1e4] sm:$0xf0] }
 0x201   : > { %v1352_v61 = vpop.f32.mrf.mxu0  ;;  %v2891_v20 = vor.u32 %v3315_v18, %v2890_v8  ;;  %v3379_v43 = vld [vmem:[%s3519_s7 + $0x3e4] sm:$0xf0] }
 0x202   : > { %v2312_v63 = vpack.c.bf16 %v2186_v47, %v2186_v47  ;;  %v1677_v5 = vadd.f32 %v1676_v14, %v1352_v61  ;;  %2500 = vst.msk [vmem:[%s3651_s29 + $0x19c] sm:$0xf] %vm2396_vm3, %v2373_v6  ;;  %v1992_v56 = vmul.f32 %v4001_v53, %v1830_v58  ;;  %v3138_v14 = vld [vmem:[%s3519_s7 + $0x3d0] sm:$0xf]  ;;  %v4335_v24 = vpop.f32.mrf.mxu3  ;;  %v3147_v61 = vor.u32 %v3379_v43, %v3146_v37 }
 0x203   : > { %v3139_v13 = vor.u32 %v3377_v3, %v3138_v14 }
 0x204   : > { %2439 = vst.msk [vmem:[%s3651_s29 + $0xa8] sm:$0xf] %vm2396_vm3, %v2312_v63  ;;  %v1931_v9 = vmul.f32 %v4001_v53, %v1677_v5  ;;  %v2122_v54 = vadd.f32 %v4010_v62, %v1992_v56 }
 0x206   : > { %v2061_v4 = vadd.f32 %v4010_v62, %v1931_v9  ;;  %v2248_v19 = vmax.f32 %v2122_v54, 0.0 }
 0x207   : > { %v1684_v16 = vpop.f32.mrf.mxu1  ;;  %v1507_v23 = vpop.f32.mrf.mxu2 }
 0x208   : > { %v2187_v32 = vmax.f32 %v2061_v4, 0.0  ;;  %v2374_v15 = vpack.c.bf16 %v2248_v19, %v2248_v19  ;;  %v1832_v17 = vadd.f32 %v4256_v21, %v1507_v23 }
 0x209   : > { %v1355_v26 = vpop.f32.mrf.mxu0 }
 0x20a   : > { %3219 = vmatmul.msk.bf16.gmra.mxu1 %vm1039_vm2, %v2903_v10  ;;  %v2313_v27 = vpack.c.bf16 %v2187_v32, %v2187_v32  ;;  %v1680_v34 = vadd.f32 %v1679_v39, %v1355_v26  ;;  %2501 = vst.msk [vmem:[%s3651_s29 + $0x1a0] sm:$0xf] %vm2396_vm3, %v2374_v15  ;;  %v1993_v22 = vmul.f32 %v4001_v53, %v1832_v17  ;;  %v4350_v0 = vpop.f32.mrf.mxu3 }
 0x20c   : > { %2440 = vst.msk [vmem:[%s3651_s29 + $0xac] sm:$0xf] %vm2396_vm3, %v2313_v27  ;;  %v1932_v31 = vmul.f32 %v4001_v53, %v1680_v34  ;;  %1394 = vmatmul.bf16.gmra.mxu0 %v2891_v20  ;;  %v2123_v21 = vadd.f32 %v4010_v62, %v1993_v22  ;;  %1549 = vmatmul.bf16.gmra.mxu2 %v3139_v13 }
 0x20e   : > { %v2062_v2 = vadd.f32 %v4010_v62, %v1932_v31  ;;  %v2249_v25 = vmax.f32 %v2123_v21, 0.0  ;;  %v4357_v62 = vld [vmem:[%s4552_s2] ss:$0 sm:$0xff] }
 0x20f   : > { %v1686_v35 = vpop.f32.mrf.mxu1  ;;  %v1510_v36 = vpop.f32.mrf.mxu2 }
 0x210   : > { %v2188_v39 = vmax.f32 %v2062_v2, 0.0  ;;  %v2375_v40 = vpack.c.bf16 %v2249_v25, %v2249_v25  ;;  %v1835_v29 = vadd.f32 %v4278_v57, %v1510_v36 }
 0x211   : > { %v1357_v33 = vpop.f32.mrf.mxu0 }
 0x212   : > { %v2314_v44 = vpack.c.bf16 %v2188_v39, %v2188_v39  ;;  %v1682_v53 = vadd.f32 %v1681_v12, %v1357_v33  ;;  %2502 = vst.msk [vmem:[%s3651_s29 + $0x1a4] sm:$0xf] %vm2396_vm3, %v2375_v40  ;;  %v1994_v38 = vmul.f32 %v4357_v62, %v1835_v29  ;;  %v1846_v56 = vpop.f32.mrf.mxu3 }
 0x214   : > { %2441 = vst.msk [vmem:[%s3651_s29 + $0xb0] sm:$0xf] %vm2396_vm3, %v2314_v44  ;;  %v1933_v57 = vmul.f32 %v4357_v62, %v1682_v53  ;;  %v2124_v49 = vadd.f32 %v4366_v48, %v1994_v38 }
 0x216   : > { %v2063_v52 = vadd.f32 %v4366_v48, %v1933_v57  ;;  %v2250_v12 = vmax.f32 %v2124_v49, 0.0 }
 0x217   : > { %v1689_v45 = vpop.f32.mrf.mxu1  ;;  %v1512_v47 = vpop.f32.mrf.mxu2 }
 0x218   : > { %v2189_v55 = vmax.f32 %v2063_v52, 0.0  ;;  %v2376_v50 = vpack.c.bf16 %v2250_v12, %v2250_v12  ;;  %v1837_v6 = vadd.f32 %v4299_v28, %v1512_v47 }
 0x219   : > { %v1360_v58 = vpop.f32.mrf.mxu0 }
 0x21a   : > { %3220 = vmatmul.msk.bf16.gmra.mxu1 %vm1039_vm2, %v2911_v51  ;;  %v2315_v63 = vpack.c.bf16 %v2189_v55, %v2189_v55  ;;  %v1685_v5 = vadd.f32 %v1684_v16, %v1360_v58  ;;  %2503 = vst.msk [vmem:[%s3651_s29 + $0x1a8] sm:$0xf] %vm2396_vm3, %v2376_v50  ;;  %v1995_v1 = vmul.f32 %v4357_v62, %v1837_v6  ;;  %v1849_v26 = vpop.f32.mrf.mxu3 }
 0x21c   : > { %2442 = vst.msk [vmem:[%s3651_s29 + $0xb4] sm:$0xf] %vm2396_vm3, %v2315_v63  ;;  %v1934_v7 = vmul.f32 %v4357_v62, %v1685_v5  ;;  %v2125_v9 = vadd.f32 %v4366_v48, %v1995_v1  ;;  %1554 = vmatmul.bf16.gmra.mxu2 %v3147_v61 }
 0x21e   : > { %v2064_v28 = vadd.f32 %v4366_v48, %v1934_v7  ;;  %v2251_v10 = vmax.f32 %v2125_v9, 0.0 }
 0x21f   : > { %v1691_v54 = vpop.f32.mrf.mxu1  ;;  %v1515_v18 = vpop.f32.mrf.mxu2 }
 0x220   : > { %v2190_v8 = vmax.f32 %v2064_v28, 0.0  ;;  %v2377_v4 = vpack.c.bf16 %v2251_v10, %v2251_v10  ;;  %v1840_v16 = vadd.f32 %v4318_v59, %v1515_v18 }
 0x221   : > { %v1362_v14 = vpop.f32.mrf.mxu0 }
 0x222   : > { %v2316_v3 = vpack.c.bf16 %v2190_v8, %v2190_v8  ;;  %v1687_v19 = vadd.f32 %v1686_v35, %v1362_v14  ;;  %2504 = vst.msk [vmem:[%s3651_s29 + $0x1ac] sm:$0xf] %vm2396_vm3, %v2377_v4  ;;  %v1996_v32 = vmul.f32 %v4357_v62, %v1840_v16  ;;  %v1851_v44 = vpop.f32.mrf.mxu3 }
 0x224   : > { %2443 = vst.msk [vmem:[%s3651_s29 + $0xb8] sm:$0xf] %vm2396_vm3, %v2316_v3  ;;  %v1935_v23 = vmul.f32 %v4357_v62, %v1687_v19  ;;  %v2126_v20 = vadd.f32 %v4366_v48, %v1996_v32 }
 0x226   : > { %v2065_v15 = vadd.f32 %v4366_v48, %v1935_v23  ;;  %v2252_v59 = vmax.f32 %v2126_v20, 0.0 }
 0x227   : > { %v1694_v17 = vpop.f32.mrf.mxu1  ;;  %v1517_v27 = vpop.f32.mrf.mxu2 }
 0x228   : > { %v2191_v13 = vmax.f32 %v2065_v15, 0.0  ;;  %v2378_v34 = vpack.c.bf16 %v2252_v59, %v2252_v59  ;;  %v1842_v22 = vadd.f32 %v4335_v24, %v1517_v27 }
 0x229   : > { %v1365_v31 = vpop.f32.mrf.mxu0 }
 0x22a   : > { %v2317_v21 = vpack.c.bf16 %v2191_v13, %v2191_v13  ;;  %v1690_v2 = vadd.f32 %v1689_v45, %v1365_v31  ;;  %2505 = vst.msk [vmem:[%s3651_s29 + $0x1b0] sm:$0xf] %vm2396_vm3, %v2378_v34  ;;  %v1997_v35 = vmul.f32 %v4357_v62, %v1842_v22  ;;  %v1854_v61 = vpop.f32.mrf.mxu3 }
 0x22c   : > { %2444 = vst.msk [vmem:[%s3651_s29 + $0xbc] sm:$0xf] %vm2396_vm3, %v2317_v21  ;;  %v1936_v25 = vmul.f32 %v4357_v62, %v1690_v2  ;;  %v2127_v39 = vadd.f32 %v4366_v48, %v1997_v35 }
 0x22e   : > { %v2066_v36 = vadd.f32 %v4366_v48, %v1936_v25  ;;  %v2253_v29 = vmax.f32 %v2127_v39, 0.0 }
 0x22f   : > { %v1696_v40 = vpop.f32.mrf.mxu1  ;;  %v1520_v33 = vpop.f32.mrf.mxu2 }
 0x230   : > { %v2192_v24 = vmax.f32 %v2066_v36, 0.0  ;;  %v2379_v53 = vpack.c.bf16 %v2253_v29, %v2253_v29  ;;  %v1845_v42 = vadd.f32 %v4350_v0, %v1520_v33 }
 0x231   : > { %v1367_v46 = vpop.f32.mrf.mxu0 }
 0x232   : > { %v2318_v38 = vpack.c.bf16 %v2192_v24, %v2192_v24  ;;  %v1692_v57 = vadd.f32 %v1691_v54, %v1367_v46  ;;  %2506 = vst.msk [vmem:[%s3651_s29 + $0x1b4] sm:$0xf] %vm2396_vm3, %v2379_v53  ;;  %v1998_v49 = vmul.f32 %v4357_v62, %v1845_v42  ;;  %v1856_v19 = vpop.f32.mrf.mxu3 }
 0x234   : > { %2445 = vst.msk [vmem:[%s3651_s29 + $0xc0] sm:$0xf] %vm2396_vm3, %v2318_v38  ;;  %v1937_v51 = vmul.f32 %v4357_v62, %v1692_v57  ;;  %v2128_v52 = vadd.f32 %v4366_v48, %v1998_v49 }
 0x236   : > { %v2067_v45 = vadd.f32 %v4366_v48, %v1937_v51  ;;  %v2254_v43 = vmax.f32 %v2128_v52, 0.0 }
 0x237   : > { %v1699_v37 = vpop.f32.mrf.mxu1  ;;  %v1522_v12 = vpop.f32.mrf.mxu2 }
 0x238   : > { %v2193_v0 = vmax.f32 %v2067_v45, 0.0  ;;  %v2380_v55 = vpack.c.bf16 %v2254_v43, %v2254_v43  ;;  %v1847_v47 = vadd.f32 %v1846_v56, %v1522_v12 }
 0x239   : > { %v1370_v50 = vpop.f32.mrf.mxu0 }
 0x23a   : > { %v2319_v6 = vpack.c.bf16 %v2193_v0, %v2193_v0  ;;  %v1695_v58 = vadd.f32 %v1694_v17, %v1370_v50  ;;  %2507 = vst.msk [vmem:[%s3651_s29 + $0x1b8] sm:$0xf] %vm2396_vm3, %v2380_v55  ;;  %v1999_v63 = vmul.f32 %v4357_v62, %v1847_v47  ;;  %v1859_v39 = vpop.f32.mrf.mxu3 }
 0x23c   : > { %2446 = vst.msk [vmem:[%s3651_s29 + $0xc4] sm:$0xf] %vm2396_vm3, %v2319_v6  ;;  %v1938_v5 = vmul.f32 %v4357_v62, %v1695_v58  ;;  %v2129_v1 = vadd.f32 %v4366_v48, %v1999_v63 }
 0x23e   : > { %v2068_v7 = vadd.f32 %v4366_v48, %v1938_v5  ;;  %v2255_v56 = vmax.f32 %v2129_v1, 0.0 }
 0x23f   : > { %v1701_v9 = vpop.f32.mrf.mxu1  ;;  %v1525_v54 = vpop.f32.mrf.mxu2 }
 0x240   : > { %v2194_v28 = vmax.f32 %v2068_v7, 0.0  ;;  %v2381_v10 = vpack.c.bf16 %v2255_v56, %v2255_v56  ;;  %v1850_v8 = vadd.f32 %v1849_v26, %v1525_v54 }
 0x241   : > { %v1372_v18 = vpop.f32.mrf.mxu0 }
 0x242   : > { %v2320_v4 = vpack.c.bf16 %v2194_v28, %v2194_v28  ;;  %v1697_v16 = vadd.f32 %v1696_v40, %v1372_v18  ;;  %2508 = vst.msk [vmem:[%s3651_s29 + $0x1bc] sm:$0xf] %vm2396_vm3, %v2381_v10  ;;  %v2000_v14 = vmul.f32 %v4357_v62, %v1850_v8  ;;  %v1861_v43 = vpop.f32.mrf.mxu3 }
 0x244   : > { %2447 = vst.msk [vmem:[%s3651_s29 + $0xc8] sm:$0xf] %vm2396_vm3, %v2320_v4  ;;  %v1939_v3 = vmul.f32 %v4357_v62, %v1697_v16  ;;  %v2130_v32 = vadd.f32 %v4366_v48, %v2000_v14 }
 0x246   : > { %v2069_v23 = vadd.f32 %v4366_v48, %v1939_v3  ;;  %v2256_v15 = vmax.f32 %v2130_v32, 0.0 }
 0x247   : > { %v1704_v20 = vpop.f32.mrf.mxu1  ;;  %v1527_v26 = vpop.f32.mrf.mxu2 }
 0x248   : > { %v2195_v17 = vmax.f32 %v2069_v23, 0.0  ;;  %v2382_v59 = vpack.c.bf16 %v2256_v15, %v2256_v15  ;;  %v1852_v13 = vadd.f32 %v1851_v44, %v1527_v26 }
 0x249   : > { %v1375_v27 = vpop.f32.mrf.mxu0 }
 0x24a   : > { %v2321_v34 = vpack.c.bf16 %v2195_v17, %v2195_v17  ;;  %v1700_v22 = vadd.f32 %v1699_v37, %v1375_v27  ;;  %2509 = vst.msk [vmem:[%s3651_s29 + $0x1c0] sm:$0xf] %vm2396_vm3, %v2382_v59  ;;  %v2001_v31 = vmul.f32 %v4357_v62, %v1852_v13  ;;  %v1864_v18 = vpop.f32.mrf.mxu3 }
 0x24c   : > { %2448 = vst.msk [vmem:[%s3651_s29 + $0xcc] sm:$0xf] %vm2396_vm3, %v2321_v34  ;;  %v1940_v21 = vmul.f32 %v4357_v62, %v1700_v22  ;;  %v2131_v2 = vadd.f32 %v4366_v48, %v2001_v31 }
 0x24e   : > { %v2070_v35 = vadd.f32 %v4366_v48, %v1940_v21  ;;  %v2257_v36 = vmax.f32 %v2131_v2, 0.0 }
 0x24f   : > { %v1706_v25 = vpop.f32.mrf.mxu1  ;;  %v1530_v29 = vpop.f32.mrf.mxu2 }
 0x250   : > { %v2196_v40 = vmax.f32 %v2070_v35, 0.0  ;;  %v2383_v24 = vpack.c.bf16 %v2257_v36, %v2257_v36  ;;  %v1855_v33 = vadd.f32 %v1854_v61, %v1530_v29 }
 0x251   : > { %v1377_v44 = vpop.f32.mrf.mxu0 }
 0x252   : > { %v2322_v53 = vpack.c.bf16 %v2196_v40, %v2196_v40  ;;  %v1702_v42 = vadd.f32 %v1701_v9, %v1377_v44  ;;  %2510 = vst.msk [vmem:[%s3651_s29 + $0x1c4] sm:$0xf] %vm2396_vm3, %v2383_v24  ;;  %v2002_v46 = vmul.f32 %v4357_v62, %v1855_v33  ;;  %v1866_v22 = vpop.f32.mrf.mxu3 }
 0x254   : > { %2449 = vst.msk [vmem:[%s3651_s29 + $0xd0] sm:$0xf] %vm2396_vm3, %v2322_v53  ;;  %v1941_v38 = vmul.f32 %v4357_v62, %v1702_v42  ;;  %v2132_v57 = vadd.f32 %v4366_v48, %v2002_v46 }
 0x256   : > { %v2071_v49 = vadd.f32 %v4366_v48, %v1941_v38  ;;  %v2258_v52 = vmax.f32 %v2132_v57, 0.0 }
 0x257   : > { %v1709_v51 = vpop.f32.mrf.mxu1  ;;  %v1532_v37 = vpop.f32.mrf.mxu2 }
 0x258   : > { %v2197_v45 = vmax.f32 %v2071_v49, 0.0  ;;  %v2384_v0 = vpack.c.bf16 %v2258_v52, %v2258_v52  ;;  %v1857_v12 = vadd.f32 %v1856_v19, %v1532_v37 }
 0x259   : > { %v1380_v55 = vpop.f32.mrf.mxu0 }
 0x25a   : > { %v2323_v47 = vpack.c.bf16 %v2197_v45, %v2197_v45  ;;  %v1705_v50 = vadd.f32 %v1704_v20, %v1380_v55  ;;  %2511 = vst.msk [vmem:[%s3651_s29 + $0x1c8] sm:$0xf] %vm2396_vm3, %v2384_v0  ;;  %v2003_v6 = vmul.f32 %v4357_v62, %v1857_v12  ;;  %v1869_v57 = vpop.f32.mrf.mxu3 }
 0x25c   : > { %2450 = vst.msk [vmem:[%s3651_s29 + $0xd4] sm:$0xf] %vm2396_vm3, %v2323_v47  ;;  %v1942_v58 = vmul.f32 %v4357_v62, %v1705_v50  ;;  %v2133_v61 = vadd.f32 %v4366_v48, %v2003_v6 }
 0x25e   : > { %v2072_v63 = vadd.f32 %v4366_v48, %v1942_v58  ;;  %v2259_v1 = vmax.f32 %v2133_v61, 0.0 }
 0x25f   : > { %v1711_v5 = vpop.f32.mrf.mxu1  ;;  %v1535_v9 = vpop.f32.mrf.mxu2 }
 0x260   : > { %v2198_v7 = vmax.f32 %v2072_v63, 0.0  ;;  %v2385_v56 = vpack.c.bf16 %v2259_v1, %v2259_v1  ;;  %v1860_v28 = vadd.f32 %v1859_v39, %v1535_v9 }
 0x261   : > { %v1382_v54 = vpop.f32.mrf.mxu0 }
 0x262   : > { %v2324_v10 = vpack.c.bf16 %v2198_v7, %v2198_v7  ;;  %v1707_v8 = vadd.f32 %v1706_v25, %v1382_v54  ;;  %2512 = vst.msk [vmem:[%s3651_s29 + $0x1cc] sm:$0xf] %vm2396_vm3, %v2385_v56  ;;  %v2004_v4 = vmul.f32 %v4357_v62, %v1860_v28  ;;  %v1871_v1 = vpop.f32.mrf.mxu3 }
 0x264   : > { %2451 = vst.msk [vmem:[%s3651_s29 + $0xd8] sm:$0xf] %vm2396_vm3, %v2324_v10  ;;  %v1943_v16 = vmul.f32 %v4357_v62, %v1707_v8  ;;  %v2134_v14 = vadd.f32 %v4366_v48, %v2004_v4 }
 0x266   : > { %v2073_v3 = vadd.f32 %v4366_v48, %v1943_v16  ;;  %v2260_v32 = vmax.f32 %v2134_v14, 0.0 }
 0x267   : > { %v1714_v19 = vpop.f32.mrf.mxu1  ;;  %v1537_v20 = vpop.f32.mrf.mxu2 }
 0x268   : > { %v2199_v23 = vmax.f32 %v2073_v3, 0.0  ;;  %v2386_v15 = vpack.c.bf16 %v2260_v32, %v2260_v32  ;;  %v1862_v17 = vadd.f32 %v1861_v43, %v1537_v20 }
 0x269   : > { %v1385_v26 = vpop.f32.mrf.mxu0 }
 0x26a   : > { %v2325_v59 = vpack.c.bf16 %v2199_v23, %v2199_v23  ;;  %v1710_v13 = vadd.f32 %v1709_v51, %v1385_v26  ;;  %2513 = vst.msk [vmem:[%s3651_s29 + $0x1d0] sm:$0xf] %vm2396_vm3, %v2386_v15  ;;  %v2005_v27 = vmul.f32 %v4357_v62, %v1862_v17 }
 0x26c   : > { %2452 = vst.msk [vmem:[%s3651_s29 + $0xdc] sm:$0xf] %vm2396_vm3, %v2325_v59  ;;  %v1944_v34 = vmul.f32 %v4357_v62, %v1710_v13  ;;  %v2135_v31 = vadd.f32 %v4366_v48, %v2005_v27  ;;  %v1874_v59 = vpop.f32.mrf.mxu3 }
 0x26e   : > { %v2074_v21 = vadd.f32 %v4366_v48, %v1944_v34  ;;  %v2261_v35 = vmax.f32 %v2135_v31, 0.0 }
 0x26f   : > { %v1716_v2 = vpop.f32.mrf.mxu1  ;;  %v1540_v39 = vpop.f32.mrf.mxu2 }
 0x270   : > { %v2200_v25 = vmax.f32 %v2074_v21, 0.0  ;;  %v2387_v36 = vpack.c.bf16 %v2261_v35, %v2261_v35  ;;  %v1865_v40 = vadd.f32 %v1864_v18, %v1540_v39 }
 0x271   : > { %v1387_v29 = vpop.f32.mrf.mxu0 }
 0x272   : > { %v2326_v24 = vpack.c.bf16 %v2200_v25, %v2200_v25  ;;  %v1712_v33 = vadd.f32 %v1711_v5, %v1387_v29  ;;  %2514 = vst.msk [vmem:[%s3651_s29 + $0x1d4] sm:$0xf] %vm2396_vm3, %v2387_v36  ;;  %v2006_v44 = vmul.f32 %v4357_v62, %v1865_v40 }
 0x274   : > { %2453 = vst.msk [vmem:[%s3651_s29 + $0xe0] sm:$0xf] %vm2396_vm3, %v2326_v24  ;;  %v1945_v53 = vmul.f32 %v4357_v62, %v1712_v33  ;;  %v2136_v42 = vadd.f32 %v4366_v48, %v2006_v44 }
 0x276   : > { %v2075_v46 = vadd.f32 %v4366_v48, %v1945_v53  ;;  %v2262_v49 = vmax.f32 %v2136_v42, 0.0 }
 0x277   : > { %v1719_v38 = vpop.f32.mrf.mxu1  ;;  %v1542_v52 = vpop.f32.mrf.mxu2 }
 0x278   : > { %v2201_v51 = vmax.f32 %v2075_v46, 0.0  ;;  %v2388_v45 = vpack.c.bf16 %v2262_v49, %v2262_v49  ;;  %v1867_v37 = vadd.f32 %v1866_v22, %v1542_v52 }
 0x279   : > { %v1390_v43 = vpop.f32.mrf.mxu0 }
 0x27a   : > { %v2327_v0 = vpack.c.bf16 %v2201_v51, %v2201_v51  ;;  %v1715_v12 = vadd.f32 %v1714_v19, %v1390_v43  ;;  %2515 = vst.msk [vmem:[%s3651_s29 + $0x1d8] sm:$0xf] %vm2396_vm3, %v2388_v45  ;;  %v2007_v55 = vmul.f32 %v4357_v62, %v1867_v37 }
 0x27c   : > { %2454 = vst.msk [vmem:[%s3651_s29 + $0xe4] sm:$0xf] %vm2396_vm3, %v2327_v0  ;;  %v1946_v47 = vmul.f32 %v4357_v62, %v1715_v12  ;;  %v2137_v50 = vadd.f32 %v4366_v48, %v2007_v55 }
 0x27e   : > { %v2076_v6 = vadd.f32 %v4366_v48, %v1946_v47  ;;  %v2263_v61 = vmax.f32 %v2137_v50, 0.0 }
 0x27f   : > { %v1721_v58 = vpop.f32.mrf.mxu1  ;;  %v1545_v5 = vpop.f32.mrf.mxu2 }
 0x280   : > { %v2202_v63 = vmax.f32 %v2076_v6, 0.0  ;;  %v2389_v7 = vpack.c.bf16 %v2263_v61, %v2263_v61  ;;  %v1870_v9 = vadd.f32 %v1869_v57, %v1545_v5 }
 0x281   : > { %v1392_v56 = vpop.f32.mrf.mxu0 }
 0x282   : > { %v2328_v28 = vpack.c.bf16 %v2202_v63, %v2202_v63  ;;  %v1717_v54 = vadd.f32 %v1716_v2, %v1392_v56  ;;  %2516 = vst.msk [vmem:[%s3651_s29 + $0x1dc] sm:$0xf] %vm2396_vm3, %v2389_v7  ;;  %v2008_v10 = vmul.f32 %v4357_v62, %v1870_v9 }
 0x284   : > { %2455 = vst.msk [vmem:[%s3651_s29 + $0xe8] sm:$0xf] %vm2396_vm3, %v2328_v28  ;;  %v1947_v8 = vmul.f32 %v4357_v62, %v1717_v54  ;;  %v2138_v18 = vadd.f32 %v4366_v48, %v2008_v10 }
 0x286   : > { %v2077_v4 = vadd.f32 %v4366_v48, %v1947_v8  ;;  %v2264_v14 = vmax.f32 %v2138_v18, 0.0 }
 0x287   : > { %v1724_v16 = vpop.f32.mrf.mxu1  ;;  %v1547_v32 = vpop.f32.mrf.mxu2 }
 0x288   : > { %v1725_v3 = vadd.f32 %v1724_v16, %v3644_v11  ;;  %v2203_v19 = vmax.f32 %v2077_v4, 0.0  ;;  %v2390_v23 = vpack.c.bf16 %v2264_v14, %v2264_v14  ;;  %v1872_v15 = vadd.f32 %v1871_v1, %v1547_v32 }
 0x289   : > { %v1395_v17 = vpop.f32.mrf.mxu0 }
 0x28a   : > { %v1950_v20 = vmul.f32 %v4357_v62, %v1725_v3  ;;  %v2329_v26 = vpack.c.bf16 %v2203_v19, %v2203_v19  ;;  %v1720_v13 = vadd.f32 %v1719_v38, %v1395_v17  ;;  %2517 = vst.msk [vmem:[%s3651_s29 + $0x1e0] sm:$0xf] %vm2396_vm3, %v2390_v23  ;;  %v2009_v34 = vmul.f32 %v4357_v62, %v1872_v15 }
 0x28c   : > { %v2080_v27 = vadd.f32 %v4366_v48, %v1950_v20  ;;  %2456 = vst.msk [vmem:[%s3651_s29 + $0xec] sm:$0xf] %vm2396_vm3, %v2329_v26  ;;  %v1948_v11 = vmul.f32 %v4357_v62, %v1720_v13  ;;  %v2139_v31 = vadd.f32 %v4366_v48, %v2009_v34 }
 0x28e   : > { %v2206_v22 = vmax.f32 %v2080_v27, 0.0  ;;  %v2078_v21 = vadd.f32 %v4366_v48, %v1948_v11  ;;  %v2265_v25 = vmax.f32 %v2139_v31, 0.0 }
 0x28f   : > { %v1726_v2 = vpop.f32.mrf.mxu1  ;;  %v1550_v40 = vpop.f32.mrf.mxu2 }
 0x290   : > { %v2332_v35 = vpack.c.bf16 %v2206_v22, %v2206_v22  ;;  %v1727_v39 = vadd.f32 %v1726_v2, %v3666_v30  ;;  %v2204_v36 = vmax.f32 %v2078_v21, 0.0  ;;  %v2391_v29 = vpack.c.bf16 %v2265_v25, %v2265_v25  ;;  %v1876_v30 = vpop.f32.mrf.mxu3 }
 0x291   : > { %v1875_v33 = vadd.f32 %v1874_v59, %v1550_v40  ;;  %v1397_v44 = vpop.f32.mrf.mxu0 }
 0x292   : > { %2459 = vst.msk [vmem:[%s3651_s29 + $0xf8] sm:$0xf] %vm2396_vm3, %v2332_v35  ;;  %v1951_v24 = vmul.f32 %v4357_v62, %v1727_v39  ;;  %v2330_v53 = vpack.c.bf16 %v2204_v36, %v2204_v36  ;;  %v1722_v42 = vadd.f32 %v1721_v58, %v1397_v44 }
 0x293   : > { %2518 = vst.msk [vmem:[%s3651_s29 + $0x1e4] sm:$0xf] %vm2396_vm3, %v2391_v29  ;;  %v2010_v38 = vmul.f32 %v4357_v62, %v1875_v33 }
 0x294   : > { %v2081_v46 = vadd.f32 %v4366_v48, %v1951_v24  ;;  %2457 = vst.msk [vmem:[%s3651_s29 + $0xf0] sm:$0xf] %vm2396_vm3, %v2330_v53  ;;  %v1949_v57 = vmul.f32 %v4357_v62, %v1722_v42 }
 0x295   : > { %v2140_v51 = vadd.f32 %v4366_v48, %v2010_v38 }
 0x296   : > { %v2207_v49 = vmax.f32 %v2081_v46, 0.0  ;;  %v2079_v52 = vadd.f32 %v4366_v48, %v1949_v57 }
 0x297   : > { %v1729_v45 = vpop.f32.mrf.mxu1  ;;  %v2266_v43 = vmax.f32 %v2140_v51, 0.0  ;;  %v1552_v55 = vpop.f32.mrf.mxu2 }
 0x298   : > { %v2333_v37 = vpack.c.bf16 %v2207_v49, %v2207_v49  ;;  %v1730_v0 = vadd.f32 %v1729_v45, %v3675_v41  ;;  %v2205_v12 = vmax.f32 %v2079_v52, 0.0  ;;  %v1877_v6 = vadd.f32 %v1876_v30, %v1552_v55  ;;  %v1879_v1 = vpop.f32.mrf.mxu3 }
 0x299   : > { %v2392_v47 = vpack.c.bf16 %v2266_v43, %v2266_v43 }
 0x29a   : > { %2460 = vst.msk [vmem:[%s3651_s29 + $0xfc] sm:$0xf] %vm2396_vm3, %v2333_v37  ;;  %v1952_v50 = vmul.f32 %v4357_v62, %v1730_v0  ;;  %v2331_v58 = vpack.c.bf16 %v2205_v12, %v2205_v12  ;;  %v2011_v63 = vmul.f32 %v4357_v62, %v1877_v6 }
 0x29b   : > { %2519 = vst.msk [vmem:[%s3651_s29 + $0x1e8] sm:$0xf] %vm2396_vm3, %v2392_v47 }
 0x29c   : > { %v2082_v61 = vadd.f32 %v4366_v48, %v1952_v50  ;;  %2458 = vst.msk [vmem:[%s3651_s29 + $0xf4] sm:$0xf] %vm2396_vm3, %v2331_v58  ;;  %v2141_v5 = vadd.f32 %v4366_v48, %v2011_v63 }
 0x29e   : > { %v2208_v41 = vmax.f32 %v2082_v61, 0.0  ;;  %v2267_v56 = vmax.f32 %v2141_v5, 0.0 }
 0x29f   : > { %v1731_v7 = vpop.f32.mrf.mxu1  ;;  %v1555_v54 = vpop.f32.mrf.mxu2 }
 0x2a0   : > { %v2334_v9 = vpack.c.bf16 %v2208_v41, %v2208_v41  ;;  %v1732_v28 = vadd.f32 %v1731_v7, %v3692_v60  ;;  %v2393_v10 = vpack.c.bf16 %v2267_v56, %v2267_v56  ;;  %v1880_v18 = vadd.f32 %v1879_v1, %v1555_v54  ;;  %v1881_v32 = vpop.f32.mrf.mxu3 }
 0x2a2   : > { %2461 = vst.msk [vmem:[%s3651_s29 + $0x100] sm:$0xf] %vm2396_vm3, %v2334_v9  ;;  %v1953_v8 = vmul.f32 %v4357_v62, %v1732_v28  ;;  %v2012_v16 = vmul.f32 %v4357_v62, %v1880_v18 }
 0x2a3   : > { %2520 = vst.msk [vmem:[%s3651_s29 + $0x1ec] sm:$0xf] %vm2396_vm3, %v2393_v10 }
 0x2a4   : > { %v2083_v4 = vadd.f32 %v4366_v48, %v1953_v8  ;;  %v2142_v3 = vadd.f32 %v4366_v48, %v2012_v16 }
 0x2a6   : > { %v2209_v14 = vmax.f32 %v2083_v4, 0.0  ;;  %v2268_v60 = vmax.f32 %v2142_v3, 0.0 }
 0x2a7   : > { %v1557_v23 = vpop.f32.mrf.mxu2 }
 0x2a8   : > { %v2335_v19 = vpack.c.bf16 %v2209_v14, %v2209_v14  ;;  %v2394_v20 = vpack.c.bf16 %v2268_v60, %v2268_v60  ;;  %v1882_v15 = vadd.f32 %v1881_v32, %v1557_v23 }
 0x2aa   : > { %2462 = vst.msk [vmem:[%s3651_s29 + $0x104] sm:$0xf] %vm2396_vm3, %v2335_v19  ;;  %v2013_v17 = vmul.f32 %v4357_v62, %v1882_v15 }
 0x2ab   : > { %2521 = vst.msk [vmem:[%s3651_s29 + $0x1f0] sm:$0xf] %vm2396_vm3, %v2394_v20 }
 0x2ac   : > { %v2143_v26 = vadd.f32 %v4366_v48, %v2013_v17 }
 0x2ae   : > { %v2269_v59 = vmax.f32 %v2143_v26, 0.0 }
 0x2b0   : > { %v2395_v13 = vpack.c.bf16 %v2269_v59, %v2269_v59 }
 0x2b2   : > { %2522 = vst.msk [vmem:[%s3651_s29 + $0x1f4] sm:$0xf] %vm2396_vm3, %v2395_v13 }
 0x2b3 PF: > { %s14_s17 = sadd.s32 1, %s3452_s17   ;;  %s4555_s15 = smov %s3448_s16 }
 0x2b4   : > { %p11_p5 = scmp.ge.s32.totalorder %s14_s17, 27   ;;  %s4556_s16 = smov %s4558_s18 }
 0x2b6   :  { %13 = sbr.rel (!%p11_p5) target bundleno = 2 (0x2), region = 75 }

</bundles_post_ra>
